<compile_context>
chip_gen: v7x
topology: tpu7x:2x2x1
jax: 0.10.0
libtpu: 0.0.40
codegen_flags: <defaults>
</compile_context>

<pallas_src>
import functools

import jax
import jax.numpy as jnp
from jax.experimental import pallas as pl
from jax.experimental.pallas import tpu as pltpu


# ---------------------------------------------------------------------------
# Problem sizes (small, consistent with the module's __init__ signature)
# ---------------------------------------------------------------------------
D_IN = 64        # q  (patch dimension, rows of Dict)
L_ATOMS = 128    # l  (number of dictionary atoms, cols of Dict)
H_1 = 32
H_2 = 32
H_3 = 32
D_OUT_LAM = 1    # lambda predictor output (broadcasts over atoms)
T_ITERS = 3      # number of ISTA iterations
BATCH = 128


def ssp_kernel(x_ref, w1_ref, b1_ref, w2_ref, b2_ref, w3_ref, b3_ref,
               w4_ref, b4_ref, dict_ref, dict_t_ref, s_ref, c_ref,
               res_ref, alpha_ref, lam_ref, *, mxu_dtype, t_iters):
    f32 = jnp.float32
    # MXU matmul helper: optionally bf16 inputs, always f32 accumulation.
    mm = lambda a, b: jnp.dot(a.astype(mxu_dtype), b.astype(mxu_dtype),
                              preferred_element_type=f32)

    x = x_ref[...]
    tile_b = x.shape[0]
    l_atoms = s_ref.shape[0]

    # ---- lambda-predictor MLP (hot matmuls on MXU) -------------------------
    h = jnp.maximum(mm(x, w1_ref[...]) + b1_ref[...], 0.0)
    h = jnp.maximum(mm(h, w2_ref[...]) + b2_ref[...], 0.0)
    h = jnp.maximum(mm(h, w3_ref[...]) + b3_ref[...], 0.0)
    # N=1 head: VPU elementwise multiply + lane reduction (skips a 1-lane MXU pass).
    lam = (jnp.sum(h * w4_ref[...], axis=1, keepdims=True)
           + (b4_ref[0, 0] + 2.0))                          # (tile_b, 1), f32

    # Scalar path: c lives in SMEM; 1/c on the scalar ALU.
    inv_c = 1.0 / c_ref[0, 0]
    # Threshold broadcast done ONCE (JAX does not CSE broadcast_in_dim).
    thr = jnp.broadcast_to(lam * inv_c, (tile_b, l_atoms))

    # ---- sparse coding (ISTA); S and Dict^T are precomputed in the wrapper --
    y = mm(x, dict_ref[...])                                # (tile_b, l)
    y_scaled = inv_c * y                                    # loop-invariant
    S = s_ref[...].astype(mxu_dtype)                        # hoisted cast (no-op in f32)

    def soft(v):
        # soft threshold: sign(v) * max(|v| - thr, 0)  ==  v - clip(v, -thr, thr)
        # (identical for the non-negative thresholds produced here, fewer VALU ops)
        return v - jnp.clip(v, -thr, thr)

    alpha = soft(y)
    for _ in range(t_iters):          # static, small trip count -> unrolled
        alpha = soft(mm(alpha, S) + y_scaled)

    # x_pred via pre-transposed Dict^T: no in-kernel XLU transpose.
    res_ref[...] = mm(alpha, dict_t_ref[...])               # (tile_b, d_in)
    alpha_ref[...] = alpha
    lam_ref[...] = lam


def _choose_tile_b(B, max_tile=512):
    """Largest batch tile (divisor of B) <= max_tile; on v7x keep >= 2 grid steps
    so both TensorCores get work."""
    n_tc = 1
    try:
        if "7" in jax.devices()[0].device_kind:   # v7x: 2 TensorCores per chip
            n_tc = 2
    except Exception:
        pass
    tile = min(B, max_tile)
    if n_tc == 2 and B >= 16 and B % 2 == 0:
        tile = min(tile, B // 2)
    while tile > 1 and B % tile != 0:
        tile -= 1
    return max(tile, 1)


def ssp_net_forward(x, params, *, tile_b=None, mxu_dtype=jnp.float32):
    """Pallas forward of SSP_Net. x: (B, D_IN) f32. Returns (res, alpha, lam)."""
    B, d_in = x.shape
    w1, b1, w2, b2, w3, b3, w4, b4, Dict, c = params
    l_atoms = Dict.shape[1]
    if tile_b is None:
        tile_b = _choose_tile_b(B)
    assert B % tile_b == 0
    grid = (B // tile_b,)

    # ---- grid-invariant precompute, hoisted out of the kernel (plain JAX) ----
    c_s = c[0, 0]
    dict_t = Dict.T                                               # (l, q)
    S = (jnp.eye(l_atoms, dtype=jnp.float32)
         - (1.0 / c_s) * (Dict.T @ Dict)).T                       # (l, l)
    w4_row = w4.reshape(1, -1)                                    # (1, H_3)

    # Batch-tiled input/outputs; parameters are small, replicated full blocks.
    full = lambda a: pl.BlockSpec(a.shape, lambda i: (0, 0))
    smem = lambda: pl.BlockSpec(memory_space=pltpu.MemorySpace.SMEM)
    in_specs = [
        pl.BlockSpec((tile_b, d_in), lambda i: (i, 0)),           # x
        full(w1), full(b1),
        full(w2), full(b2),
        full(w3), full(b3),
        full(w4_row), smem(),                                     # w4 row, b4 scalar
        full(Dict), full(dict_t), full(S),
        smem(),                                                   # c scalar
    ]
    out_specs = [
        pl.BlockSpec((tile_b, d_in), lambda i: (i, 0)),           # res (x_pred)
        pl.BlockSpec((tile_b, l_atoms), lambda i: (i, 0)),        # alpha_sparse
        pl.BlockSpec((tile_b, D_OUT_LAM), lambda i: (i, 0)),      # lam
    ]
    out_shape = (
        jax.ShapeDtypeStruct((B, d_in), jnp.float32),
        jax.ShapeDtypeStruct((B, l_atoms), jnp.float32),
        jax.ShapeDtypeStruct((B, D_OUT_LAM), jnp.float32),
    )

    kernel = functools.partial(ssp_kernel, mxu_dtype=mxu_dtype, t_iters=T_ITERS)
    return pl.pallas_call(
        kernel,
        out_shape=out_shape,
        grid=grid,
        in_specs=in_specs,
        out_specs=out_specs,
        compiler_params=pltpu.CompilerParams(
            dimension_semantics=("parallel",)),
    )(x, w1, b1, w2, b2, w3, b3, w4_row, b4, Dict, dict_t, S, c)


def init_params(key):
    """Deterministic parameter init (shapes follow SSP_Net.__init__)."""
    ks = jax.random.split(key, 9)
    def lin(kw, fan_in, fan_out):
        scale = 1.0 / jnp.sqrt(fan_in)
        w = jax.random.uniform(kw, (fan_in, fan_out), jnp.float32, -scale, scale)
        b = jnp.zeros((1, fan_out), jnp.float32)
        return w, b
    w1, b1 = lin(ks[0], D_IN, H_1)
    w2, b2 = lin(ks[1], H_1, H_2)
    w3, b3 = lin(ks[2], H_2, H_3)
    w4, b4 = lin(ks[3], H_3, D_OUT_LAM)
    # Dict_init: (q, l) with unit-norm atoms (typical KSVD init)
    Dict = jax.random.normal(ks[4], (D_IN, L_ATOMS), jnp.float32)
    Dict = Dict / jnp.linalg.norm(Dict, axis=0, keepdims=True)
    # c_init: scalar > largest eigenvalue of Dict^T Dict (for ISTA stability)
    c = jnp.array([[8.0]], jnp.float32)
    return (w1, b1, w2, b2, w3, b3, w4, b4, Dict, c)


def ssp_net_reference(x, params, t_iters=T_ITERS):
    """Pure-JAX reference mirroring the torch forward (for sanity check)."""
    w1, b1, w2, b2, w3, b3, w4, b4, Dict, c = params
    c_s = c[0, 0]
    h = jnp.maximum(x @ w1 + b1, 0.0)
    h = jnp.maximum(h @ w2 + b2, 0.0)
    h = jnp.maximum(h @ w3 + b3, 0.0)
    lam = h @ w4 + b4 + 2.0
    thr = lam / c_s
    y = x @ Dict
    S = (jnp.eye(Dict.shape[1]) - (1.0 / c_s) * (Dict.T @ Dict)).T
    soft = lambda v: jnp.sign(v) * jnp.maximum(jnp.abs(v) - thr, 0.0)
    alpha = soft(y)
    for _ in range(t_iters):
        alpha = soft(alpha @ S + (1.0 / c_s) * y)
    return alpha @ Dict.T, alpha, lam


if __name__ == "__main__":
    key = jax.random.PRNGKey(0)
    k_x, k_p = jax.random.split(key)
    x = jax.random.normal(k_x, (BATCH, D_IN), jnp.float32)
    params = init_params(k_p)
    # The torch forward takes N but never uses it; nothing to pass here.

    # f32 MXU path: strict check against the torch-faithful reference.
    res, alpha, lam = jax.block_until_ready(ssp_net_forward(x, params))
    r_ref, a_ref, l_ref = ssp_net_reference(x, params)
    assert jnp.allclose(res, r_ref, atol=1e-4, rtol=1e-4)
    assert jnp.allclose(alpha, a_ref, atol=1e-4, rtol=1e-4)
    assert jnp.allclose(lam, l_ref, atol=1e-4, rtol=1e-4)

    # bf16-MXU-input path (f32 accumulation / f32 ISTA state): looser check.
    res_bf, alpha_bf, lam_bf = jax.block_until_ready(
        ssp_net_forward(x, params, mxu_dtype=jnp.bfloat16))
    assert jnp.allclose(lam_bf, l_ref, atol=5e-2, rtol=5e-2)
    assert jnp.allclose(alpha_bf, a_ref, atol=2.5e-1, rtol=5e-2)
    assert jnp.allclose(res_bf, r_ref, atol=2.5e-1, rtol=5e-2)

    print("KERNEL_OK")
</pallas_src>

<mosaic_0001>
module attributes {stable_mosaic.version = 11 : i64} {
  func.func @ssp_kernel(%arg0: i32, %arg1: memref<128x64xf32, #tpu.memory_space<vmem>>, %arg2: memref<64x32xf32, #tpu.memory_space<vmem>>, %arg3: memref<1x32xf32, #tpu.memory_space<vmem>>, %arg4: memref<32x32xf32, #tpu.memory_space<vmem>>, %arg5: memref<1x32xf32, #tpu.memory_space<vmem>>, %arg6: memref<32x32xf32, #tpu.memory_space<vmem>>, %arg7: memref<1x32xf32, #tpu.memory_space<vmem>>, %arg8: memref<1x32xf32, #tpu.memory_space<vmem>>, %arg9: memref<1x1xf32, #tpu.memory_space<smem>>, %arg10: memref<64x128xf32, #tpu.memory_space<vmem>>, %arg11: memref<128x64xf32, #tpu.memory_space<vmem>>, %arg12: memref<128x128xf32, #tpu.memory_space<vmem>>, %arg13: memref<1x1xf32, #tpu.memory_space<smem>>, %arg14: memref<128x64xf32, #tpu.memory_space<vmem>>, %arg15: memref<128x128xf32, #tpu.memory_space<vmem>>, %arg16: memref<128x1xf32, #tpu.memory_space<vmem>>) attributes {dimension_semantics = [#tpu.dimension_semantics<parallel>], iteration_bounds = array<i64: 1>, scalar_prefetch = 0 : i64, scratch_operands = 0 : i64, tpu.core_type = #tpu.core_type<tc>, window_params = [{transform_indices = @transform_0, window_bounds = array<i64: 128, 64>}, {pipeline_mode = #tpu.pipeline_mode<synchronous>, transform_indices = @transform_1, window_bounds = array<i64: 64, 32>}, {pipeline_mode = #tpu.pipeline_mode<synchronous>, transform_indices = @transform_2, window_bounds = array<i64: 1, 32>}, {pipeline_mode = #tpu.pipeline_mode<synchronous>, transform_indices = @transform_3, window_bounds = array<i64: 32, 32>}, {pipeline_mode = #tpu.pipeline_mode<synchronous>, transform_indices = @transform_4, window_bounds = array<i64: 1, 32>}, {pipeline_mode = #tpu.pipeline_mode<synchronous>, transform_indices = @transform_5, window_bounds = array<i64: 32, 32>}, {pipeline_mode = #tpu.pipeline_mode<synchronous>, transform_indices = @transform_6, window_bounds = array<i64: 1, 32>}, {pipeline_mode = #tpu.pipeline_mode<synchronous>, transform_indices = @transform_7, window_bounds = array<i64: 1, 32>}, {transform_indices = @transform_8, window_bounds = array<i64: 1, 1>}, {pipeline_mode = #tpu.pipeline_mode<synchronous>, transform_indices = @transform_9, window_bounds = array<i64: 64, 128>}, {pipeline_mode = #tpu.pipeline_mode<synchronous>, transform_indices = @transform_10, window_bounds = array<i64: 128, 64>}, {pipeline_mode = #tpu.pipeline_mode<synchronous>, transform_indices = @transform_11, window_bounds = array<i64: 128, 128>}, {transform_indices = @transform_12, window_bounds = array<i64: 1, 1>}, {transform_indices = @transform_13, window_bounds = array<i64: 128, 64>}, {transform_indices = @transform_14, window_bounds = array<i64: 128, 128>}, {transform_indices = @transform_15, window_bounds = array<i64: 128, 1>}]} {
    %c0 = arith.constant 0 : index
    %c0_0 = arith.constant 0 : index
    %0 = vector.load %arg1[%c0, %c0_0] : memref<128x64xf32, #tpu.memory_space<vmem>>, vector<128x64xf32>
    %c0_1 = arith.constant 0 : index
    %c0_2 = arith.constant 0 : index
    %1 = vector.load %arg2[%c0_1, %c0_2] : memref<64x32xf32, #tpu.memory_space<vmem>>, vector<64x32xf32>
    %cst = arith.constant dense<0.000000e+00> : vector<128x32xf32>
    %2 = tpu.matmul %0, %1, %cst {dimension_numbers = #tpu.dot_dimension_numbers<[1], [0], [0], [1], [0, 0, 1, 1], [], []>} : vector<128x64xf32>, vector<64x32xf32>, vector<128x32xf32> -> vector<128x32xf32>
    %c0_3 = arith.constant 0 : index
    %c0_4 = arith.constant 0 : index
    %3 = vector.load %arg3[%c0_3, %c0_4] : memref<1x32xf32, #tpu.memory_space<vmem>>, vector<1x32xf32>
    %4 = vector.broadcast %3 : vector<1x32xf32> to vector<128x32xf32>
    %5 = arith.addf %2, %4 : vector<128x32xf32>
    %cst_5 = arith.constant 0.000000e+00 : f32
    %6 = vector.broadcast %cst_5 : f32 to vector<128x32xf32>
    %7 = arith.maximumf %5, %6 : vector<128x32xf32>
    %c0_6 = arith.constant 0 : index
    %c0_7 = arith.constant 0 : index
    %8 = vector.load %arg4[%c0_6, %c0_7] : memref<32x32xf32, #tpu.memory_space<vmem>>, vector<32x32xf32>
    %cst_8 = arith.constant dense<0.000000e+00> : vector<128x32xf32>
    %9 = tpu.matmul %7, %8, %cst_8 {dimension_numbers = #tpu.dot_dimension_numbers<[1], [0], [0], [1], [0, 0, 1, 1], [], []>} : vector<128x32xf32>, vector<32x32xf32>, vector<128x32xf32> -> vector<128x32xf32>
    %c0_9 = arith.constant 0 : index
    %c0_10 = arith.constant 0 : index
    %10 = vector.load %arg5[%c0_9, %c0_10] : memref<1x32xf32, #tpu.memory_space<vmem>>, vector<1x32xf32>
    %11 = vector.broadcast %10 : vector<1x32xf32> to vector<128x32xf32>
    %12 = arith.addf %9, %11 : vector<128x32xf32>
    %cst_11 = arith.constant 0.000000e+00 : f32
    %13 = vector.broadcast %cst_11 : f32 to vector<128x32xf32>
    %14 = arith.maximumf %12, %13 : vector<128x32xf32>
    %c0_12 = arith.constant 0 : index
    %c0_13 = arith.constant 0 : index
    %15 = vector.load %arg6[%c0_12, %c0_13] : memref<32x32xf32, #tpu.memory_space<vmem>>, vector<32x32xf32>
    %cst_14 = arith.constant dense<0.000000e+00> : vector<128x32xf32>
    %16 = tpu.matmul %14, %15, %cst_14 {dimension_numbers = #tpu.dot_dimension_numbers<[1], [0], [0], [1], [0, 0, 1, 1], [], []>} : vector<128x32xf32>, vector<32x32xf32>, vector<128x32xf32> -> vector<128x32xf32>
    %c0_15 = arith.constant 0 : index
    %c0_16 = arith.constant 0 : index
    %17 = vector.load %arg7[%c0_15, %c0_16] : memref<1x32xf32, #tpu.memory_space<vmem>>, vector<1x32xf32>
    %18 = vector.broadcast %17 : vector<1x32xf32> to vector<128x32xf32>
    %19 = arith.addf %16, %18 : vector<128x32xf32>
    %cst_17 = arith.constant 0.000000e+00 : f32
    %20 = vector.broadcast %cst_17 : f32 to vector<128x32xf32>
    %21 = arith.maximumf %19, %20 : vector<128x32xf32>
    %c0_18 = arith.constant 0 : index
    %c0_19 = arith.constant 0 : index
    %22 = vector.load %arg8[%c0_18, %c0_19] : memref<1x32xf32, #tpu.memory_space<vmem>>, vector<1x32xf32>
    %23 = vector.broadcast %22 : vector<1x32xf32> to vector<128x32xf32>
    %24 = arith.mulf %21, %23 : vector<128x32xf32>
    %cst_20 = arith.constant dense<0.000000e+00> : vector<128xf32>
    %25 = vector.multi_reduction <add>, %24, %cst_20 [1] : vector<128x32xf32> to vector<128xf32>
    %26 = vector.shape_cast %25 : vector<128xf32> to vector<128x1xf32>
    %c0_21 = arith.constant 0 : index
    %c0_22 = arith.constant 0 : index
    %27 = memref.load %arg9[%c0_21, %c0_22] : memref<1x1xf32, #tpu.memory_space<smem>>
    %cst_23 = arith.constant 2.000000e+00 : f32
    %28 = arith.addf %27, %cst_23 : f32
    %29 = vector.broadcast %28 : f32 to vector<128x1xf32>
    %30 = arith.addf %26, %29 : vector<128x1xf32>
    %c0_24 = arith.constant 0 : index
    %c0_25 = arith.constant 0 : index
    %31 = memref.load %arg13[%c0_24, %c0_25] : memref<1x1xf32, #tpu.memory_space<smem>>
    %cst_26 = arith.constant 1.000000e+00 : f32
    %32 = arith.divf %cst_26, %31 : f32
    %33 = vector.broadcast %32 : f32 to vector<128x1xf32>
    %34 = arith.mulf %30, %33 : vector<128x1xf32>
    %35 = vector.shape_cast %34 : vector<128x1xf32> to vector<128x1xf32>
    %36 = vector.broadcast %35 : vector<128x1xf32> to vector<128x128xf32>
    %c0_27 = arith.constant 0 : index
    %c0_28 = arith.constant 0 : index
    %37 = vector.load %arg10[%c0_27, %c0_28] : memref<64x128xf32, #tpu.memory_space<vmem>>, vector<64x128xf32>
    %cst_29 = arith.constant dense<0.000000e+00> : vector<128x128xf32>
    %38 = tpu.matmul %0, %37, %cst_29 {dimension_numbers = #tpu.dot_dimension_numbers<[1], [0], [0], [1], [0, 0, 1, 1], [], []>} : vector<128x64xf32>, vector<64x128xf32>, vector<128x128xf32> -> vector<128x128xf32>
    %39 = vector.broadcast %32 : f32 to vector<128x128xf32>
    %40 = arith.mulf %39, %38 : vector<128x128xf32>
    %c0_30 = arith.constant 0 : index
    %c0_31 = arith.constant 0 : index
    %41 = vector.load %arg12[%c0_30, %c0_31] : memref<128x128xf32, #tpu.memory_space<vmem>>, vector<128x128xf32>
    %cst_32 = arith.constant 0.000000e+00 : f32
    %42 = vector.broadcast %cst_32 : f32 to vector<128x128xf32>
    %43 = arith.subf %42, %36 : vector<128x128xf32>
    %44 = arith.maximumf %43, %38 : vector<128x128xf32>
    %45 = arith.minimumf %36, %44 : vector<128x128xf32>
    %46 = arith.subf %38, %45 : vector<128x128xf32>
    %cst_33 = arith.constant dense<0.000000e+00> : vector<128x128xf32>
    %47 = tpu.matmul %46, %41, %cst_33 {dimension_numbers = #tpu.dot_dimension_numbers<[1], [0], [0], [1], [0, 0, 1, 1], [], []>} : vector<128x128xf32>, vector<128x128xf32>, vector<128x128xf32> -> vector<128x128xf32>
    %48 = arith.addf %47, %40 : vector<128x128xf32>
    %cst_34 = arith.constant 0.000000e+00 : f32
    %49 = vector.broadcast %cst_34 : f32 to vector<128x128xf32>
    %50 = arith.subf %49, %36 : vector<128x128xf32>
    %51 = arith.maximumf %50, %48 : vector<128x128xf32>
    %52 = arith.minimumf %36, %51 : vector<128x128xf32>
    %53 = arith.subf %48, %52 : vector<128x128xf32>
    %cst_35 = arith.constant dense<0.000000e+00> : vector<128x128xf32>
    %54 = tpu.matmul %53, %41, %cst_35 {dimension_numbers = #tpu.dot_dimension_numbers<[1], [0], [0], [1], [0, 0, 1, 1], [], []>} : vector<128x128xf32>, vector<128x128xf32>, vector<128x128xf32> -> vector<128x128xf32>
    %55 = arith.addf %54, %40 : vector<128x128xf32>
    %cst_36 = arith.constant 0.000000e+00 : f32
    %56 = vector.broadcast %cst_36 : f32 to vector<128x128xf32>
    %57 = arith.subf %56, %36 : vector<128x128xf32>
    %58 = arith.maximumf %57, %55 : vector<128x128xf32>
    %59 = arith.minimumf %36, %58 : vector<128x128xf32>
    %60 = arith.subf %55, %59 : vector<128x128xf32>
    %cst_37 = arith.constant dense<0.000000e+00> : vector<128x128xf32>
    %61 = tpu.matmul %60, %41, %cst_37 {dimension_numbers = #tpu.dot_dimension_numbers<[1], [0], [0], [1], [0, 0, 1, 1], [], []>} : vector<128x128xf32>, vector<128x128xf32>, vector<128x128xf32> -> vector<128x128xf32>
    %62 = arith.addf %61, %40 : vector<128x128xf32>
    %cst_38 = arith.constant 0.000000e+00 : f32
    %63 = vector.broadcast %cst_38 : f32 to vector<128x128xf32>
    %64 = arith.subf %63, %36 : vector<128x128xf32>
    %65 = arith.maximumf %64, %62 : vector<128x128xf32>
    %66 = arith.minimumf %36, %65 : vector<128x128xf32>
    %67 = arith.subf %62, %66 : vector<128x128xf32>
    %c0_39 = arith.constant 0 : index
    %c0_40 = arith.constant 0 : index
    %68 = vector.load %arg11[%c0_39, %c0_40] : memref<128x64xf32, #tpu.memory_space<vmem>>, vector<128x64xf32>
    %cst_41 = arith.constant dense<0.000000e+00> : vector<128x64xf32>
    %69 = tpu.matmul %67, %68, %cst_41 {dimension_numbers = #tpu.dot_dimension_numbers<[1], [0], [0], [1], [0, 0, 1, 1], [], []>} : vector<128x128xf32>, vector<128x64xf32>, vector<128x64xf32> -> vector<128x64xf32>
    %c0_42 = arith.constant 0 : index
    %c0_43 = arith.constant 0 : index
    %70 = vector.load %arg14[%c0_42, %c0_43] : memref<128x64xf32, #tpu.memory_space<vmem>>, vector<128x64xf32>
    tpu.vector_store %arg14[%c0_42, %c0_43], %69 {strides = array<i32>} : memref<128x64xf32, #tpu.memory_space<vmem>>, vector<128x64xf32>,
    %c0_44 = arith.constant 0 : index
    %c0_45 = arith.constant 0 : index
    %71 = vector.load %arg15[%c0_44, %c0_45] : memref<128x128xf32, #tpu.memory_space<vmem>>, vector<128x128xf32>
    tpu.vector_store %arg15[%c0_44, %c0_45], %67 {strides = array<i32>} : memref<128x128xf32, #tpu.memory_space<vmem>>, vector<128x128xf32>,
    %c0_46 = arith.constant 0 : index
    %c0_47 = arith.constant 0 : index
    %72 = vector.load %arg16[%c0_46, %c0_47] : memref<128x1xf32, #tpu.memory_space<vmem>>, vector<128x1xf32>
    tpu.vector_store %arg16[%c0_46, %c0_47], %30 {strides = array<i32>} : memref<128x1xf32, #tpu.memory_space<vmem>>, vector<128x1xf32>,
    return
  }
  func.func @transform_0(%arg0: i32) -> (i32, i32) {
    %c0_i32 = arith.constant 0 : i32
    %c0_i32_0 = arith.constant 0 : i32
    return %arg0, %c0_i32 : i32, i32
  }
  func.func @transform_1(%arg0: i32) -> (i32, i32) {
    %c0_i32 = arith.constant 0 : i32
    %c0_i32_0 = arith.constant 0 : i32
    %c0_i32_1 = arith.constant 0 : i32
    return %c0_i32, %c0_i32_0 : i32, i32
  }
  func.func @transform_2(%arg0: i32) -> (i32, i32) {
    %c0_i32 = arith.constant 0 : i32
    %c0_i32_0 = arith.constant 0 : i32
    %c0_i32_1 = arith.constant 0 : i32
    return %c0_i32, %c0_i32_0 : i32, i32
  }
  func.func @transform_3(%arg0: i32) -> (i32, i32) {
    %c0_i32 = arith.constant 0 : i32
    %c0_i32_0 = arith.constant 0 : i32
    %c0_i32_1 = arith.constant 0 : i32
    return %c0_i32, %c0_i32_0 : i32, i32
  }
  func.func @transform_4(%arg0: i32) -> (i32, i32) {
    %c0_i32 = arith.constant 0 : i32
    %c0_i32_0 = arith.constant 0 : i32
    %c0_i32_1 = arith.constant 0 : i32
    return %c0_i32, %c0_i32_0 : i32, i32
  }
  func.func @transform_5(%arg0: i32) -> (i32, i32) {
    %c0_i32 = arith.constant 0 : i32
    %c0_i32_0 = arith.constant 0 : i32
    %c0_i32_1 = arith.constant 0 : i32
    return %c0_i32, %c0_i32_0 : i32, i32
  }
  func.func @transform_6(%arg0: i32) -> (i32, i32) {
    %c0_i32 = arith.constant 0 : i32
    %c0_i32_0 = arith.constant 0 : i32
    %c0_i32_1 = arith.constant 0 : i32
    return %c0_i32, %c0_i32_0 : i32, i32
  }
  func.func @transform_7(%arg0: i32) -> (i32, i32) {
    %c0_i32 = arith.constant 0 : i32
    %c0_i32_0 = arith.constant 0 : i32
    %c0_i32_1 = arith.constant 0 : i32
    return %c0_i32, %c0_i32_0 : i32, i32
  }
  func.func @transform_8(%arg0: i32) -> (i32, i32) {
    %c0_i32 = arith.constant 0 : i32
    %c0_i32_0 = arith.constant 0 : i32
    %c0_i32_1 = arith.constant 0 : i32
    return %c0_i32, %c0_i32_0 : i32, i32
  }
  func.func @transform_9(%arg0: i32) -> (i32, i32) {
    %c0_i32 = arith.constant 0 : i32
    %c0_i32_0 = arith.constant 0 : i32
    %c0_i32_1 = arith.constant 0 : i32
    return %c0_i32, %c0_i32_0 : i32, i32
  }
  func.func @transform_10(%arg0: i32) -> (i32, i32) {
    %c0_i32 = arith.constant 0 : i32
    %c0_i32_0 = arith.constant 0 : i32
    %c0_i32_1 = arith.constant 0 : i32
    return %c0_i32, %c0_i32_0 : i32, i32
  }
  func.func @transform_11(%arg0: i32) -> (i32, i32) {
    %c0_i32 = arith.constant 0 : i32
    %c0_i32_0 = arith.constant 0 : i32
    %c0_i32_1 = arith.constant 0 : i32
    return %c0_i32, %c0_i32_0 : i32, i32
  }
  func.func @transform_12(%arg0: i32) -> (i32, i32) {
    %c0_i32 = arith.constant 0 : i32
    %c0_i32_0 = arith.constant 0 : i32
    %c0_i32_1 = arith.constant 0 : i32
    return %c0_i32, %c0_i32_0 : i32, i32
  }
  func.func @transform_13(%arg0: i32) -> (i32, i32) {
    %c0_i32 = arith.constant 0 : i32
    %c0_i32_0 = arith.constant 0 : i32
    return %arg0, %c0_i32 : i32, i32
  }
  func.func @transform_14(%arg0: i32) -> (i32, i32) {
    %c0_i32 = arith.constant 0 : i32
    %c0_i32_0 = arith.constant 0 : i32
    return %arg0, %c0_i32 : i32, i32
  }
  func.func @transform_15(%arg0: i32) -> (i32, i32) {
    %c0_i32 = arith.constant 0 : i32
    %c0_i32_0 = arith.constant 0 : i32
    return %arg0, %c0_i32 : i32, i32
  }
}

</mosaic_0001>

<bundles_post_ra>
// kernel: tpu_custom_call.1
= control target key start
LH: loop header
LB: loop body
LE: loop exit
PB: predicated region body
PF: predicated region fallthrough
CT: control target
= control target key end

     0   :  { %vm81_vm0 = vcmask 523264   ;;  %s3945_s0 = inlined_call_operand.vmem [shape: f32[128,64], index: 0, kind: input, shape index: {}]   ;;  %s3946_s1 = inlined_call_operand.vmem [shape: f32[64,32], index: 1, kind: input, shape index: {}]   ;;  %s3947_s2 = inlined_call_operand.vmem [shape: f32[1,32], index: 2, kind: input, shape index: {}]   ;;  %s3948_s3 = inlined_call_operand.vmem [shape: f32[32,32], index: 3, kind: input, shape index: {}]   ;;  %s3949_s4 = inlined_call_operand.vmem [shape: f32[1,32], index: 4, kind: input, shape index: {}]   ;;  %s3950_s5 = inlined_call_operand.vmem [shape: f32[32,32], index: 5, kind: input, shape index: {}]   ;;  %s3951_s6 = inlined_call_operand.vmem [shape: f32[1,32], index: 6, kind: input, shape index: {}]   ;;  %s3952_s7 = inlined_call_operand.vmem [shape: f32[1,32], index: 7, kind: input, shape index: {}]   ;;  %s3953_s8 = inlined_call_operand.<no memory space> [shape: f32[1,1], index: 8, kind: input, shape index: {}]   ;;  %s3954_s9 = inlined_call_operand.vmem [shape: f32[64,128], index: 9, kind: input, shape index: {}]   ;;  %s3955_s10 = inlined_call_operand.vmem [shape: f32[128,64], index: 10, kind: input, shape index: {}]   ;;  %s3956_s11 = inlined_call_operand.vmem [shape: f32[128,128], index: 11, kind: input, shape index: {}]   ;;  %s3957_s12 = inlined_call_operand.<no memory space> [shape: f32[1,1], index: 12, kind: input, shape index: {}]   ;;  %s3958_s13 = inlined_call_operand.vmem [shape: f32[128,64], index: 13, kind: output, shape index: {0}]   ;;  %s3959_s14 = inlined_call_operand.hbm [shape: f32[128,128], index: 14, kind: output, shape index: {1}]   ;;  %s3960_s15 = inlined_call_operand.vmem [shape: f32[128,1], index: 15, kind: output, shape index: {2}]  }
   0x1   :  { %v66_v0 = vld [vmem:[%s3946_s1] sm:$0xff]  ;;  %v67_v1 = vld [vmem:[%s3946_s1 + $0x8] sm:$0xff]  ;;  %v68_v2 = vld [vmem:[%s3946_s1 + $0x10] sm:$0xff] }
   0x2   :  { %v2557_v3 = vpack.c.bf16 %v67_v1, %v66_v0  ;;  %v69_v4 = vld [vmem:[%s3946_s1 + $0x18] sm:$0xff]  ;;  %v70_v6 = vld [vmem:[%s3946_s1 + $0x20] sm:$0xff]  ;;  %v71_v7 = vld [vmem:[%s3946_s1 + $0x28] sm:$0xff] }
   0x3   :  { %v2561_v5 = vpack.c.bf16 %v69_v4, %v68_v2  ;;  %v50_v8 = vld [vmem:[%s3945_s0] sm:$0xff]  ;;  %v2565_v9 = vpack.c.bf16 %v71_v7, %v70_v6  ;;  %v72_v10 = vld [vmem:[%s3946_s1 + $0x30] sm:$0xff]  ;;  %v73_v11 = vld [vmem:[%s3946_s1 + $0x38] sm:$0xff] }
   0x4   :  { %2558 = vmatprep.subr.bf16.mxu0 %v2557_v3  ;;  %2205 = vmatprep.mubr.msk.f32.mxu0 %vm81_vm0, %v50_v8  ;;  %v291_v12 = vld [vmem:[%s3948_s3] sm:$0xff]  ;;  %v292_v13 = vld [vmem:[%s3948_s3 + $0x8] sm:$0xff] }
   0x5   :  { %2560 = vmatpush3.bf16.msra.mxu0 %v2557_v3 }
   0x6   :  { %2562 = vmatprep.subr.bf16.mxu0 %v2561_v5 }
   0x9   :  { %2564 = vmatpush3.bf16.msra.mxu0 %v2561_v5 }
   0xa   :  { %23 = vsyncpa [#allocation5], 0  ;;  %2566 = vmatprep.subr.bf16.mxu0 %v2565_v9  ;;  %v2569_v14 = vpack.c.bf16 %v73_v11, %v72_v10  ;;  %v2573_v15 = vpack.c.bf16 %v292_v13, %v291_v12  ;;  %v2900_v16 = vld [vmem:[%s3945_s0 + $0x8] sm:$0xff]  ;;  %v2905_v17 = vld [vmem:[%s3945_s0 + $0x10] sm:$0xff]  ;;  %vm302_vm1 = vcmask 261120   ;;  %s804_s1 = sadd.f32 2.0, %s3953_s8 }
   0xb   :  { %v2914_v18 = vld [vmem:[%s3945_s0 + $0x18] sm:$0xff]  ;;  %v2919_v19 = vld [vmem:[%s3945_s0 + $0x20] sm:$0xff]  ;;  %v2928_v20 = vld [vmem:[%s3945_s0 + $0x28] sm:$0xff]  ;;  %vm1864_vm2 = vcmask 7168  }
   0xc   :  { %2574 = vmatprep.subr.bf16.mxu1 %v2573_v15  ;;  %v2933_v21 = vld [vmem:[%s3945_s0 + $0x30] sm:$0xff]  ;;  %v2942_v22 = vld [vmem:[%s3945_s0 + $0x38] sm:$0xff]  ;;  %v2947_v23 = vld [vmem:[%s3945_s0 + $0x40] sm:$0xff] }
   0xd   :  { %2568 = vmatpush3.bf16.msra.mxu0 %v2565_v9  ;;  %2576 = vmatpush3.bf16.msra.mxu1 %v2573_v15  ;;  %v2956_v24 = vld [vmem:[%s3945_s0 + $0x48] sm:$0xff]  ;;  %v2961_v25 = vld [vmem:[%s3945_s0 + $0x50] sm:$0xff]  ;;  %v2970_v26 = vld [vmem:[%s3945_s0 + $0x58] sm:$0xff] }
   0xe   :  { %2570 = vmatprep.subr.bf16.mxu0 %v2569_v14  ;;  %v2975_v27 = vld [vmem:[%s3945_s0 + $0x60] sm:$0xff]  ;;  %v2984_v28 = vld [vmem:[%s3945_s0 + $0x68] sm:$0xff]  ;;  %v2989_v29 = vld [vmem:[%s3945_s0 + $0x70] sm:$0xff] }
   0xf   :  { %v2998_v30 = vld [vmem:[%s3945_s0 + $0x78] sm:$0xff]  ;;  %v293_v31 = vld [vmem:[%s3948_s3 + $0x10] sm:$0xff]  ;;  %v512_v34 = vld [vmem:[%s3950_s5] sm:$0xff] }
  0x10   :  { %v294_v32 = vld [vmem:[%s3948_s3 + $0x18] sm:$0xff]  ;;  %v513_v35 = vld [vmem:[%s3950_s5 + $0x8] sm:$0xff]  ;;  %v3018_v37 = vld [vmem:[%s3947_s2] ss:$0 sm:$0xff] }
  0x11   :  { %2572 = vmatpush3.bf16.msra.mxu0 %v2569_v14  ;;  %v2577_v33 = vpack.c.bf16 %v294_v32, %v293_v31  ;;  %v2581_v36 = vpack.c.bf16 %v513_v35, %v512_v34  ;;  %v514_v42 = vld [vmem:[%s3950_s5 + $0x10] sm:$0xff]  ;;  %v515_v43 = vld [vmem:[%s3950_s5 + $0x18] sm:$0xff] }
  0x12   :  { %v2585_v49 = vpack.c.bf16 %v515_v43, %v514_v42  ;;  %v844_v42 = vld [vmem:[%s3954_s9 + $0x8] sm:$0xff] }
  0x13   :  { %2578 = vmatprep.subr.bf16.mxu1 %v2577_v33 }
  0x14   :  { %2206 = vmatmul.mubr.msk.f32.vlgmr.msra.gmra.mrb[0].mxu0 %vm81_vm0, %v2900_v16  ;;  %2580 = vmatpush3.bf16.msra.mxu1 %v2577_v33 }
  0x15   :  { %2208 = vmatprep.mubr.msk.f32.mxu0 %vm81_vm0, %v2905_v17  ;;  %2582 = vmatprep.subr.bf16.mxu1 %v2581_v36 }
  0x18   :  { %2209 = vmatmul.mubr.msk.f32.gmra.mrb[2].mxu0 %vm81_vm0, %v2914_v18 }
  0x19   :  { %2211 = vmatprep.mubr.msk.f32.mxu0 %vm81_vm0, %v2919_v19 }
  0x1c   :  { %2212 = vmatmul.mubr.msk.f32.gmra.mrb[4].mxu0 %vm81_vm0, %v2928_v20 }
  0x1d   :  { %2214 = vmatprep.mubr.msk.f32.mxu0 %vm81_vm0, %v2933_v21 }
  0x20   :  { %2215 = vmatmul.mubr.msk.f32.gmra.mrb[6].mxu0 %vm81_vm0, %v2942_v22 }
  0x21   :  { %2217 = vmatprep.mubr.msk.f32.mxu0 %vm81_vm0, %v2947_v23 }
  0x24   :  { %2218 = vmatmul.mubr.msk.f32.gmra.mrb[8].mxu0 %vm81_vm0, %v2956_v24 }
  0x25   :  { %2220 = vmatprep.mubr.msk.f32.mxu0 %vm81_vm0, %v2961_v25 }
  0x28   :  { %2221 = vmatmul.mubr.msk.f32.gmra.mrb[10].mxu0 %vm81_vm0, %v2970_v26 }
  0x29   :  { %2223 = vmatprep.mubr.msk.f32.mxu0 %vm81_vm0, %v2975_v27 }
  0x2c   :  { %2224 = vmatmul.mubr.msk.f32.gmra.mrb[12].mxu0 %vm81_vm0, %v2984_v28 }
  0x2d   :  { %2226 = vmatprep.mubr.msk.f32.mxu0 %vm81_vm0, %v2989_v29 }
  0x30   :  { %2227 = vmatmul.mubr.msk.f32.gmra.mrb[14].mxu0 %vm81_vm0, %v2998_v30 }
  0x31   :  { %2309 = vmatprep.mubr.msk.f32.mxu0 %vm81_vm0, %v50_v8 }
  0xe7   :  { %v2207_v38 = vpop.f32.mrb[0].mxu0 }
  0xe8   :  { %v202_v39 = vadd.f32 %v2207_v38, %v3018_v37  ;;  %v196_v40 = vpop.f32.mrb[1].mxu0 }
  0xe9   :  { %v197_v41 = vadd.f32 %v3018_v37, %v196_v40 }
  0xea   :  { %v276_v46 = vmax.f32 %v202_v39, 0.0 }
  0xeb   :  { %v275_v44 = vmax.f32 %v197_v41, 0.0  ;;  %v2210_v45 = vpop.f32.mrb[2].mxu0  ;;  %v843_v41 = vld [vmem:[%s3954_s9] sm:$0xff] }
  0xec   :  { %v212_v47 = vadd.f32 %v2210_v45, %v3018_v37  ;;  %v206_v48 = vpop.f32.mrb[3].mxu0  ;;  %v2589_v43 = vpack.c.bf16 %v844_v42, %v843_v41  ;;  %v1014_v41 = vld [vmem:[%s3956_s11 + $0x10] sm:$0xff] }
  0xed   :  { %v207_v50 = vadd.f32 %v3018_v37, %v206_v48  ;;  %2237 = vmatprep.mubr.msk.f32.mxu1 %vm302_vm1, %v275_v44  ;;  %v846_v44 = vld [vmem:[%s3954_s9 + $0x18] sm:$0xff] }
  0xee   :  { %2238 = vmatmul.mubr.msk.f32.vlgmr.msra.gmra.mrb[0].mxu1 %vm302_vm1, %v276_v46  ;;  %v278_v53 = vmax.f32 %v212_v47, 0.0  ;;  %v847_v46 = vld [vmem:[%s3954_s9 + $0x20] sm:$0xff]  ;;  %v848_v47 = vld [vmem:[%s3954_s9 + $0x28] sm:$0xff]  ;;  %2590 = vmatprep.subr.bf16.mxu0 %v2589_v43 }
  0xef   :  { %v277_v51 = vmax.f32 %v207_v50, 0.0  ;;  %v2213_v52 = vpop.f32.mrb[4].mxu0  ;;  %2584 = vmatpush3.bf16.msra.mxu1 %v2581_v36  ;;  %2592 = vmatpush3.bf16.msra.mxu0 %v2589_v43  ;;  %v2597_v48 = vpack.c.bf16 %v848_v47, %v847_v46  ;;  %v850_v50 = vld [vmem:[%s3954_s9 + $0x38] sm:$0xff] }
  0xf0   :  { %v222_v54 = vadd.f32 %v2213_v52, %v3018_v37  ;;  %v216_v55 = vpop.f32.mrb[5].mxu0  ;;  %2586 = vmatprep.subr.bf16.mxu1 %v2585_v49 }
  0xf1   :  { %v217_v56 = vadd.f32 %v3018_v37, %v216_v55  ;;  %2240 = vmatprep.mubr.msk.f32.mxu1 %vm302_vm1, %v277_v51 }
  0xf2   :  { %v280_v57 = vmax.f32 %v222_v54, 0.0  ;;  %2241 = vmatmul.mubr.msk.f32.gmra.mrb[2].mxu1 %vm302_vm1, %v278_v53 }
  0xf3   :  { %v279_v58 = vmax.f32 %v217_v56, 0.0  ;;  %v2216_v59 = vpop.f32.mrb[6].mxu0  ;;  %2588 = vmatpush3.bf16.msra.mxu1 %v2585_v49  ;;  %v849_v49 = vld [vmem:[%s3954_s9 + $0x30] sm:$0xff] }
  0xf4   :  { %v232_v60 = vadd.f32 %v2216_v59, %v3018_v37  ;;  %v226_v61 = vpop.f32.mrb[7].mxu0  ;;  %v2601_v51 = vpack.c.bf16 %v850_v50, %v849_v49  ;;  %v1019_v49 = vld [vmem:[%s3956_s11 + $0x38] sm:$0xff] }
  0xf5   :  { %v227_v62 = vadd.f32 %v3018_v37, %v226_v61  ;;  %2243 = vmatprep.mubr.msk.f32.mxu1 %vm302_vm1, %v279_v58 }
  0xf6   :  { %v282_v63 = vmax.f32 %v232_v60, 0.0  ;;  %2244 = vmatmul.mubr.msk.f32.gmra.mrb[4].mxu1 %vm302_vm1, %v280_v57 }
  0xf7   :  { %v281_v0 = vmax.f32 %v227_v62, 0.0  ;;  %v2219_v1 = vpop.f32.mrb[8].mxu0 }
  0xf8   :  { %v242_v2 = vadd.f32 %v2219_v1, %v3018_v37  ;;  %v236_v3 = vpop.f32.mrb[9].mxu0 }
  0xf9   :  { %v237_v4 = vadd.f32 %v3018_v37, %v236_v3  ;;  %2246 = vmatprep.mubr.msk.f32.mxu1 %vm302_vm1, %v281_v0 }
  0xfa   :  { %v284_v5 = vmax.f32 %v242_v2, 0.0  ;;  %2247 = vmatmul.mubr.msk.f32.gmra.mrb[6].mxu1 %vm302_vm1, %v282_v63 }
  0xfb   :  { %v283_v6 = vmax.f32 %v237_v4, 0.0  ;;  %v2222_v7 = vpop.f32.mrb[10].mxu0 }
  0xfc   :  { %v252_v8 = vadd.f32 %v2222_v7, %v3018_v37  ;;  %v246_v9 = vpop.f32.mrb[11].mxu0 }
  0xfd   :  { %v247_v10 = vadd.f32 %v3018_v37, %v246_v9  ;;  %2249 = vmatprep.mubr.msk.f32.mxu1 %vm302_vm1, %v283_v6 }
  0xfe   :  { %v286_v11 = vmax.f32 %v252_v8, 0.0  ;;  %2250 = vmatmul.mubr.msk.f32.gmra.mrb[8].mxu1 %vm302_vm1, %v284_v5 }
  0xff   :  { %v285_v12 = vmax.f32 %v247_v10, 0.0  ;;  %v2225_v13 = vpop.f32.mrb[12].mxu0 }
 0x100   :  { %v262_v14 = vadd.f32 %v2225_v13, %v3018_v37  ;;  %v256_v15 = vpop.f32.mrb[13].mxu0 }
 0x101   :  { %v257_v31 = vadd.f32 %v3018_v37, %v256_v15  ;;  %2252 = vmatprep.mubr.msk.f32.mxu1 %vm302_vm1, %v285_v12 }
 0x102   :  { %v288_v32 = vmax.f32 %v262_v14, 0.0  ;;  %2253 = vmatmul.mubr.msk.f32.gmra.mrb[10].mxu1 %vm302_vm1, %v286_v11 }
 0x103   :  { %v287_v33 = vmax.f32 %v257_v31, 0.0  ;;  %v2228_v34 = vpop.f32.mrb[14].mxu0 }
 0x104   :  { %v272_v35 = vadd.f32 %v2228_v34, %v3018_v37  ;;  %v266_v36 = vpop.f32.mrb[15].mxu0 }
 0x105   :  { %v267_v38 = vadd.f32 %v3018_v37, %v266_v36  ;;  %2255 = vmatprep.mubr.msk.f32.mxu1 %vm302_vm1, %v287_v33  ;;  %v845_v37 = vld [vmem:[%s3954_s9 + $0x10] sm:$0xff] }
 0x106   :  { %v290_v39 = vmax.f32 %v272_v35, 0.0  ;;  %2256 = vmatmul.mubr.msk.f32.gmra.mrb[12].mxu1 %vm302_vm1, %v288_v32  ;;  %v2593_v45 = vpack.c.bf16 %v846_v44, %v845_v37  ;;  %v1015_v37 = vld [vmem:[%s3956_s11 + $0x18] sm:$0xff]  ;;  %v1016_v44 = vld [vmem:[%s3956_s11 + $0x20] sm:$0xff] }
 0x107   :  { %v289_v40 = vmax.f32 %v267_v38, 0.0  ;;  %v823_v38 = vstv %s3957_s12  ;;  %v3148_v43 = vpack.c.bf16 %v1015_v37, %v1014_v41 }
 0x108   :  { %2594 = vmatprep.subr.bf16.mxu0 %v2593_v45  ;;  %2754 = vrcp.f32 %v823_v38 }
 0x109   :  { %2258 = vmatprep.mubr.msk.f32.mxu1 %vm302_vm1, %v289_v40  ;;  %2596 = vmatpush3.bf16.msra.mxu0 %v2593_v45  ;;  %v1013_v40 = vld [vmem:[%s3956_s11 + $0x8] sm:$0xff] }
 0x10a   :  { %2259 = vmatmul.mubr.msk.f32.gmra.mrb[14].mxu1 %vm302_vm1, %v290_v39  ;;  %2598 = vmatprep.subr.bf16.mxu0 %v2597_v48  ;;  %v1012_v39 = vld [vmem:[%s3956_s11] sm:$0xff]  ;;  %v1017_v45 = vld [vmem:[%s3956_s11 + $0x28] sm:$0xff] }
 0x10b   :  { %v3143_v42 = vpack.c.bf16 %v1013_v40, %v1012_v39  ;;  %v3161_v46 = vpack.c.bf16 %v1017_v45, %v1016_v44 }
 0x10d   :  { %2600 = vmatpush3.bf16.msra.mxu0 %v2597_v48  ;;  %2606 = vmatprep.subr.bf16.mxu1 %v3143_v42  ;;  %v1018_v48 = vld [vmem:[%s3956_s11 + $0x30] sm:$0xff] }
 0x10e   :  { %2602 = vmatprep.subr.bf16.mxu0 %v2601_v51 }
 0x111   :  { %2604 = vmatpush3.bf16.msra.mxu0 %v2601_v51  ;;  %v3177_v51 = vpack.c.bf16 %v1019_v49, %v1018_v48 }
 0x112   :  { %2638 = vmatprep.subr.bf16.mxu0 %v3143_v42 }
 0x114   :  { %2310 = vmatmul.mubr.msk.f32.vlgmr.msra.gmra.mrb[16].mxu0 %vm81_vm0, %v2900_v16  ;;  %v1922_v16 = vld [vmem:[%s3949_s4] ss:$0 sm:$0xff] }
 0x115   :  { %2312 = vmatprep.mubr.msk.f32.mxu0 %vm81_vm0, %v2905_v17  ;;  %2640 = vmatpush3.bf16.msra.mxu0 %v3143_v42 }
 0x116   :  { %2642 = vmatprep.subr.bf16.mxu0 %v3148_v43 }
 0x118   :  { %2313 = vmatmul.mubr.msk.f32.gmra.mrb[18].mxu0 %vm81_vm0, %v2914_v18 }
 0x119   :  { %2315 = vmatprep.mubr.msk.f32.mxu0 %vm81_vm0, %v2919_v19  ;;  %2644 = vmatpush3.bf16.msra.mxu0 %v3148_v43 }
 0x11a   :  { %2646 = vmatprep.subr.bf16.mxu0 %v3161_v46 }
 0x11c   :  { %2316 = vmatmul.mubr.msk.f32.gmra.mrb[20].mxu0 %vm81_vm0, %v2928_v20 }
 0x11d   :  { %2318 = vmatprep.mubr.msk.f32.mxu0 %vm81_vm0, %v2933_v21  ;;  %2648 = vmatpush3.bf16.msra.mxu0 %v3161_v46 }
 0x11e   :  { %2650 = vmatprep.subr.bf16.mxu0 %v3177_v51 }
 0x120   :  { %2319 = vmatmul.mubr.msk.f32.gmra.mrb[22].mxu0 %vm81_vm0, %v2942_v22 }
 0x121   :  { %2321 = vmatprep.mubr.msk.f32.mxu0 %vm81_vm0, %v2947_v23  ;;  %2652 = vmatpush3.bf16.msra.mxu0 %v3177_v51 }
 0x124   :  { %2322 = vmatmul.mubr.msk.f32.gmra.mrb[24].mxu0 %vm81_vm0, %v2956_v24 }
 0x125   :  { %2324 = vmatprep.mubr.msk.f32.mxu0 %vm81_vm0, %v2961_v25 }
 0x128   :  { %2325 = vmatmul.mubr.msk.f32.gmra.mrb[26].mxu0 %vm81_vm0, %v2970_v26 }
 0x129   :  { %2327 = vmatprep.mubr.msk.f32.mxu0 %vm81_vm0, %v2975_v27 }
 0x12c   :  { %2328 = vmatmul.mubr.msk.f32.gmra.mrb[28].mxu0 %vm81_vm0, %v2984_v28 }
 0x12d   :  { %2330 = vmatprep.mubr.msk.f32.mxu0 %vm81_vm0, %v2989_v29 }
 0x130   :  { %2331 = vmatmul.mubr.msk.f32.gmra.mrb[30].mxu0 %vm81_vm0, %v2998_v30 }
 0x1c1   :  { %v2239_v17 = vpop.f32.mrb[0].mxu1 }
 0x1c2   :  { %v423_v18 = vadd.f32 %v2239_v17, %v1922_v16  ;;  %v417_v19 = vpop.f32.mrb[1].mxu1  ;;  %v1020_v17 = vld [vmem:[%s3956_s11 + $0x40] sm:$0xff] }
 0x1c3   :  { %v418_v20 = vadd.f32 %v1922_v16, %v417_v19  ;;  %v2755_v19 = vpop.eup %2754 }
 0x1c4   :  { %v497_v23 = vmax.f32 %v423_v18, 0.0  ;;  %v1021_v18 = vld [vmem:[%s3956_s11 + $0x48] sm:$0xff]  ;;  %2749 = vpush %v2755_v19 }
 0x1c5   :  { %v496_v21 = vmax.f32 %v418_v20, 0.0  ;;  %v2242_v22 = vpop.f32.mrb[2].mxu1 }
 0x1c6   :  { %v433_v24 = vadd.f32 %v2242_v22, %v1922_v16  ;;  %v427_v25 = vpop.f32.mrb[3].mxu1 }
 0x1c7   :  { %v428_v26 = vadd.f32 %v1922_v16, %v427_v25  ;;  %2269 = vmatprep.mubr.msk.f32.mxu1 %vm302_vm1, %v496_v21  ;;  %v3193_v21 = vpack.c.bf16 %v1021_v18, %v1020_v17 }
 0x1c8   :  { %2270 = vmatmul.mubr.msk.f32.vlgmr.msra.gmra.mrb[16].mxu1 %vm302_vm1, %v497_v23  ;;  %v499_v29 = vmax.f32 %v433_v24, 0.0 }
 0x1c9   :  { %v498_v27 = vmax.f32 %v428_v26, 0.0  ;;  %v2245_v28 = vpop.f32.mrb[4].mxu1  ;;  %2608 = vmatpush3.bf16.msra.mxu1 %v3143_v42  ;;  %2654 = vmatprep.subr.bf16.mxu0 %v3193_v21 }
 0x1ca   :  { %v443_v30 = vadd.f32 %v2245_v28, %v1922_v16  ;;  %v437_v52 = vpop.f32.mrb[5].mxu1  ;;  %2610 = vmatprep.subr.bf16.mxu1 %v3148_v43  ;;  %2656 = vmatpush3.bf16.msra.mxu0 %v3193_v21 }
 0x1cb   :  { %v438_v53 = vadd.f32 %v1922_v16, %v437_v52  ;;  %2272 = vmatprep.mubr.msk.f32.mxu1 %vm302_vm1, %v498_v27 }
 0x1cc   :  { %v501_v54 = vmax.f32 %v443_v30, 0.0  ;;  %2273 = vmatmul.mubr.msk.f32.gmra.mrb[18].mxu1 %vm302_vm1, %v499_v29  ;;  %v3219_v29 = vld [vmem:[%s3951_s6] ss:$0 sm:$0xff] }
 0x1cd   :  { %v500_v55 = vmax.f32 %v438_v53, 0.0  ;;  %v2248_v56 = vpop.f32.mrb[6].mxu1  ;;  %2612 = vmatpush3.bf16.msra.mxu1 %v3148_v43 }
 0x1ce   :  { %v453_v57 = vadd.f32 %v2248_v56, %v1922_v16  ;;  %v447_v58 = vpop.f32.mrb[7].mxu1  ;;  %2614 = vmatprep.subr.bf16.mxu1 %v3161_v46 }
 0x1cf   :  { %v448_v59 = vadd.f32 %v1922_v16, %v447_v58  ;;  %2275 = vmatprep.mubr.msk.f32.mxu1 %vm302_vm1, %v500_v55  ;;  %v3226_v55 = vld [vmem:[%s3952_s7] ss:$0 sm:$0xff] }
 0x1d0   :  { %v503_v60 = vmax.f32 %v453_v57, 0.0  ;;  %2276 = vmatmul.mubr.msk.f32.gmra.mrb[20].mxu1 %vm302_vm1, %v501_v54 }
 0x1d1   :  { %v502_v61 = vmax.f32 %v448_v59, 0.0  ;;  %v2251_v62 = vpop.f32.mrb[8].mxu1  ;;  %2616 = vmatpush3.bf16.msra.mxu1 %v3161_v46 }
 0x1d2   :  { %v463_v63 = vadd.f32 %v2251_v62, %v1922_v16  ;;  %v457_v0 = vpop.f32.mrb[9].mxu1  ;;  %2618 = vmatprep.subr.bf16.mxu1 %v3177_v51 }
 0x1d3   :  { %v458_v1 = vadd.f32 %v1922_v16, %v457_v0  ;;  %2278 = vmatprep.mubr.msk.f32.mxu1 %vm302_vm1, %v502_v61 }
 0x1d4   :  { %v505_v2 = vmax.f32 %v463_v63, 0.0  ;;  %2279 = vmatmul.mubr.msk.f32.gmra.mrb[22].mxu1 %vm302_vm1, %v503_v60 }
 0x1d5   :  { %v504_v3 = vmax.f32 %v458_v1, 0.0  ;;  %v2254_v4 = vpop.f32.mrb[10].mxu1  ;;  %2620 = vmatpush3.bf16.msra.mxu1 %v3177_v51 }
 0x1d6   :  { %v473_v5 = vadd.f32 %v2254_v4, %v1922_v16  ;;  %v467_v6 = vpop.f32.mrb[11].mxu1  ;;  %2622 = vmatprep.subr.bf16.mxu1 %v3193_v21 }
 0x1d7   :  { %v468_v7 = vadd.f32 %v1922_v16, %v467_v6  ;;  %2281 = vmatprep.mubr.msk.f32.mxu1 %vm302_vm1, %v504_v3 }
 0x1d8   :  { %v507_v8 = vmax.f32 %v473_v5, 0.0  ;;  %2282 = vmatmul.mubr.msk.f32.gmra.mrb[24].mxu1 %vm302_vm1, %v505_v2 }
 0x1d9   :  { %v506_v9 = vmax.f32 %v468_v7, 0.0  ;;  %v2257_v10 = vpop.f32.mrb[12].mxu1  ;;  %2624 = vmatpush3.bf16.msra.mxu1 %v3193_v21 }
 0x1da   :  { %v483_v11 = vadd.f32 %v2257_v10, %v1922_v16  ;;  %v477_v12 = vpop.f32.mrb[13].mxu1 }
 0x1db   :  { %v478_v13 = vadd.f32 %v1922_v16, %v477_v12  ;;  %2284 = vmatprep.mubr.msk.f32.mxu1 %vm302_vm1, %v506_v9 }
 0x1dc   :  { %v509_v14 = vmax.f32 %v483_v11, 0.0  ;;  %2285 = vmatmul.mubr.msk.f32.gmra.mrb[26].mxu1 %vm302_vm1, %v507_v8 }
 0x1dd   :  { %v508_v15 = vmax.f32 %v478_v13, 0.0  ;;  %v2260_v31 = vpop.f32.mrb[14].mxu1 }
 0x1de   :  { %v493_v32 = vadd.f32 %v2260_v31, %v1922_v16  ;;  %v487_v33 = vpop.f32.mrb[15].mxu1 }
 0x1df   :  { %v488_v34 = vadd.f32 %v1922_v16, %v487_v33  ;;  %2287 = vmatprep.mubr.msk.f32.mxu1 %vm302_vm1, %v508_v15 }
 0x1e0   :  { %v511_v35 = vmax.f32 %v493_v32, 0.0  ;;  %2288 = vmatmul.mubr.msk.f32.gmra.mrb[28].mxu1 %vm302_vm1, %v509_v14 }
 0x1e1   :  { %v510_v36 = vmax.f32 %v488_v34, 0.0 }
 0x1e3   :  { %2290 = vmatprep.mubr.msk.f32.mxu1 %vm302_vm1, %v510_v36 }
 0x1e4   :  { %2291 = vmatmul.mubr.msk.f32.gmra.mrb[30].mxu1 %vm302_vm1, %v511_v35 }
 0x1e7   :  { %v3164_v47 = vpop.f32.mrb[16].mxu0 }
 0x1e8   :  { %v3172_v50 = vpop.f32.mrb[17].mxu0 }
 0x1eb   :  { %v3180_v16 = vpop.f32.mrb[18].mxu0 }
 0x1ec   :  { %v3188_v20 = vpop.f32.mrb[19].mxu0 }
 0x1ef   :  { %v3196_v22 = vpop.f32.mrb[20].mxu0 }
 0x1f0   :  { %v3198_v23 = vpop.f32.mrb[21].mxu0 }
 0x1f3   :  { %v3204_v24 = vpop.f32.mrb[22].mxu0 }
 0x1f4   :  { %v3206_v25 = vpop.f32.mrb[23].mxu0 }
 0x1f5   :  { %s2750_s26 = spop %2749 }
 0x1f7   :  { %v3210_v26 = vpop.f32.mrb[24].mxu0 }
 0x1f8   :  { %v3212_v27 = vpop.f32.mrb[25].mxu0 }
 0x1fb   :  { %v3214_v28 = vpop.f32.mrb[26].mxu0 }
 0x29b   :  { %v2271_v30 = vpop.f32.mrb[16].mxu1 }
 0x29c   :  { %v643_v52 = vadd.f32 %v2271_v30, %v3219_v29  ;;  %v637_v53 = vpop.f32.mrb[17].mxu1 }
 0x29d   :  { %v638_v54 = vadd.f32 %v3219_v29, %v637_v53 }
 0x29e   :  { %v717_v56 = vmax.f32 %v643_v52, 0.0 }
 0x29f   :  { %v716_v57 = vmax.f32 %v638_v54, 0.0  ;;  %v2274_v58 = vpop.f32.mrb[18].mxu1 }
 0x2a0   :  { %v653_v59 = vadd.f32 %v2274_v58, %v3219_v29  ;;  %v647_v60 = vpop.f32.mrb[19].mxu1  ;;  %v740_v3 = vmul.f32 %v3226_v55, %v717_v56 }
 0x2a1   :  { %v648_v61 = vadd.f32 %v3219_v29, %v647_v60  ;;  %v739_v62 = vmul.f32 %v3226_v55, %v716_v57  ;;  %v3254_v57 = vpop.f32.mrb[27].mxu0 }
 0x2a2   :  { %v719_v63 = vmax.f32 %v653_v59, 0.0  ;;  %v758_v12 = vsel %vm302_vm1, %v740_v3, 0.0 }
 0x2a3   :  { %v718_v0 = vmax.f32 %v648_v61, 0.0  ;;  %v2277_v1 = vpop.f32.mrb[20].mxu1  ;;  %v755_v2 = vsel %vm302_vm1, %v739_v62, 0.0 }
 0x2a4   :  { %v663_v4 = vadd.f32 %v2277_v1, %v3219_v29  ;;  %v657_v5 = vpop.f32.mrb[21].mxu1  ;;  %756 = vadd.xlane.f32.xlu0 %v755_v2  ;;  %v742_v13 = vmul.f32 %v3226_v55, %v719_v63  ;;  %v3259_v63 = vpop.f32.mrb[28].mxu0 }
 0x2a5   :  { %v658_v6 = vadd.f32 %v3219_v29, %v657_v5  ;;  %v741_v7 = vmul.f32 %v3226_v55, %v718_v0  ;;  %v3262_v2 = vpop.f32.mrb[29].mxu0 }
 0x2a6   :  { %v721_v8 = vmax.f32 %v663_v4, 0.0  ;;  %v764_v38 = vsel %vm302_vm1, %v742_v13, 0.0  ;;  %v3266_v5 = vpop.f32.mrb[30].mxu0 }
 0x2a7   :  { %v720_v9 = vmax.f32 %v658_v6, 0.0  ;;  %v2280_v10 = vpop.f32.mrb[22].mxu1  ;;  %v761_v11 = vsel %vm302_vm1, %v741_v7, 0.0  ;;  %v3269_v7 = vpop.f32.mrb[31].mxu0 }
 0x2a8   :  { %v673_v14 = vadd.f32 %v2280_v10, %v3219_v29  ;;  %v667_v15 = vpop.f32.mrb[23].mxu1  ;;  %762 = vadd.xlane.f32.xlu1 %v761_v11  ;;  %759 = vadd.xlane.f32.xlu0 %v758_v12  ;;  %v744_v33 = vmul.f32 %v3226_v55, %v721_v8 }
 0x2a9   :  { %v668_v31 = vadd.f32 %v3219_v29, %v667_v15  ;;  %v743_v32 = vmul.f32 %v3226_v55, %v720_v9 }
 0x2aa   :  { %v723_v34 = vmax.f32 %v673_v14, 0.0  ;;  %v770_v45 = vsel %vm302_vm1, %v744_v33, 0.0  ;;  %v1023_v33 = vld [vmem:[%s3956_s11 + $0x58] sm:$0xff] }
 0x2ab   :  { %v722_v35 = vmax.f32 %v668_v31, 0.0  ;;  %v2283_v36 = vpop.f32.mrb[24].mxu1  ;;  %v767_v39 = vsel %vm302_vm1, %v743_v32, 0.0  ;;  %v1022_v32 = vld [vmem:[%s3956_s11 + $0x50] sm:$0xff] }
 0x2ac   :  { %v683_v40 = vadd.f32 %v2283_v36, %v3219_v29  ;;  %v677_v41 = vpop.f32.mrb[25].mxu1  ;;  %765 = vadd.xlane.f32.xlu1 %v764_v38  ;;  %768 = vadd.xlane.f32.xlu0 %v767_v39  ;;  %v746_v19 = vmul.f32 %v3226_v55, %v723_v34 }
 0x2ad   :  { %v678_v37 = vadd.f32 %v3219_v29, %v677_v41  ;;  %v745_v44 = vmul.f32 %v3226_v55, %v722_v35  ;;  %v1024_v35 = vld [vmem:[%s3956_s11 + $0x60] sm:$0xff]  ;;  %v3291_v41 = vpack.c.bf16 %v1023_v33, %v1022_v32 }
 0x2ae   :  { %v725_v48 = vmax.f32 %v683_v40, 0.0  ;;  %v776_v60 = vsel %vm302_vm1, %v746_v19, 0.0 }
 0x2af   :  { %v724_v49 = vmax.f32 %v678_v37, 0.0  ;;  %v2286_v17 = vpop.f32.mrb[26].mxu1  ;;  %v773_v18 = vsel %vm302_vm1, %v745_v44, 0.0  ;;  %2626 = vmatprep.subr.bf16.mxu1 %v3291_v41  ;;  %2658 = vmatprep.subr.bf16.mxu0 %v3291_v41 }
 0x2b0   :  { %v693_v30 = vadd.f32 %v2286_v17, %v3219_v29  ;;  %v687_v52 = vpop.f32.mrb[27].mxu1  ;;  %771 = vadd.xlane.f32.xlu1 %v770_v45  ;;  %774 = vadd.xlane.f32.xlu0 %v773_v18  ;;  %v748_v62 = vmul.f32 %v3226_v55, %v725_v48  ;;  %v1026_v45 = vld [vmem:[%s3956_s11 + $0x70] sm:$0xff]  ;;  %v1027_v48 = vld [vmem:[%s3956_s11 + $0x78] sm:$0xff] }
 0x2b1   :  { %v688_v53 = vadd.f32 %v3219_v29, %v687_v52  ;;  %v747_v54 = vmul.f32 %v3226_v55, %v724_v49  ;;  %2628 = vmatpush3.bf16.msra.mxu1 %v3291_v41  ;;  %2660 = vmatpush3.bf16.msra.mxu0 %v3291_v41  ;;  %v3309_v19 = vpack.c.bf16 %v1027_v48, %v1026_v45 }
 0x2b2   :  { %v727_v56 = vmax.f32 %v693_v30, 0.0  ;;  %v782_v11 = vsel %vm302_vm1, %v748_v62, 0.0 }
 0x2b3   :  { %v726_v58 = vmax.f32 %v688_v53, 0.0  ;;  %v2289_v59 = vpop.f32.mrb[28].mxu1  ;;  %v779_v61 = vsel %vm302_vm1, %v747_v54, 0.0  ;;  %v3326_v53 = vstv %s2750_s26 }
 0x2b4   :  { %v703_v0 = vadd.f32 %v2289_v59, %v3219_v29  ;;  %v697_v1 = vpop.f32.mrb[29].mxu1  ;;  %777 = vadd.xlane.f32.xlu1 %v776_v60  ;;  %780 = vadd.xlane.f32.xlu0 %v779_v61  ;;  %v750_v6 = vmul.f32 %v3226_v55, %v727_v56 }
 0x2b5   :  { %v698_v3 = vadd.f32 %v3219_v29, %v697_v1  ;;  %v749_v4 = vmul.f32 %v3226_v55, %v726_v58 }
 0x2b6   :  { %v729_v8 = vmax.f32 %v703_v0, 0.0  ;;  %v788_v34 = vsel %vm302_vm1, %v750_v6, 0.0 }
 0x2b7   :  { %v728_v9 = vmax.f32 %v698_v3, 0.0  ;;  %v2292_v10 = vpop.f32.mrb[30].mxu1  ;;  %v785_v12 = vsel %vm302_vm1, %v749_v4, 0.0 }
 0x2b8   :  { %v713_v13 = vadd.f32 %v2292_v10, %v3219_v29  ;;  %v707_v14 = vpop.f32.mrb[31].mxu1  ;;  %783 = vadd.xlane.f32.xlu1 %v782_v11  ;;  %786 = vadd.xlane.f32.xlu0 %v785_v12  ;;  %v752_v40 = vmul.f32 %v3226_v55, %v729_v8 }
 0x2b9   :  { %v708_v15 = vadd.f32 %v3219_v29, %v707_v14  ;;  %v751_v31 = vmul.f32 %v3226_v55, %v728_v9  ;;  %v1025_v29 = vld [vmem:[%s3956_s11 + $0x68] sm:$0xff] }
 0x2ba   :  { %v731_v36 = vmax.f32 %v713_v13, 0.0  ;;  %v3294_v44 = vpack.c.bf16 %v1025_v29, %v1024_v35  ;;  %v794_v49 = vsel %vm302_vm1, %v752_v40, 0.0 }
 0x2bb   :  { %v730_v38 = vmax.f32 %v708_v15, 0.0  ;;  %v791_v39 = vsel %vm302_vm1, %v751_v31, 0.0 }
 0x2bc   :  { %789 = vadd.xlane.f32.xlu1 %v788_v34  ;;  %792 = vadd.xlane.f32.xlu0 %v791_v39  ;;  %v754_v18 = vmul.f32 %v3226_v55, %v731_v36 }
 0x2bd   :  { %v753_v37 = vmul.f32 %v3226_v55, %v730_v38  ;;  %2630 = vmatprep.subr.bf16.mxu1 %v3294_v44  ;;  %2662 = vmatprep.subr.bf16.mxu0 %v3294_v44  ;;  %v3324_v55 = vstv %s804_s1 }
 0x2be   :  { %v800_v30 = vsel %vm302_vm1, %v754_v18, 0.0  ;;  %2632 = vmatpush3.bf16.msra.mxu1 %v3294_v44  ;;  %2664 = vmatpush3.bf16.msra.mxu0 %v3294_v44 }
 0x2bf   :  { %v797_v17 = vsel %vm302_vm1, %v753_v37, 0.0  ;;  %2634 = vmatprep.subr.bf16.mxu1 %v3309_v19  ;;  %2666 = vmatprep.subr.bf16.mxu0 %v3309_v19 }
 0x2c0   :  { %795 = vadd.xlane.f32.xlu1 %v794_v49  ;;  %798 = vadd.xlane.f32.xlu0 %v797_v17 }
 0x2c2   :  { %2636 = vmatpush3.bf16.msra.mxu1 %v3309_v19  ;;  %2668 = vmatpush3.bf16.msra.mxu0 %v3309_v19 }
 0x2c3   :  { %2670 = vmatprep.subr.bf16.mxu1 %v3143_v42 }
 0x2c4   :  { %801 = vadd.xlane.f32.xlu1 %v800_v30 }
 0x331   :  { %v757_v52 = vpop.xlane.xlu0 %756 }
 0x332   :  { %v806_v54 = vadd.f32 %v3324_v55, %v757_v52 }
 0x334   :  { %1865 = vst.msk [vmem:[%s3960_s15] sm:$0xff] %vm1864_vm2, %v806_v54  ;;  %v3334_v56 = vmul.f32 %v3326_v53, %v806_v54 }
 0x335   :  { %v763_v58 = vpop.xlane.xlu1 %762  ;;  %v760_v59 = vpop.xlane.xlu0 %759 }
 0x336   :  { %v3337_v60 = vsub.f32 0.0, %v3334_v56  ;;  %v808_v61 = vadd.f32 %v3324_v55, %v763_v58  ;;  %v807_v62 = vadd.f32 %v3324_v55, %v760_v59 }
 0x338   :  { %3980 = vst [vmem:[#allocation7_spill] sm:$0xff] %v3337_v60  ;;  %v3342_v0 = vmul.f32 %v3326_v53, %v808_v61  ;;  %1867 = vst.msk [vmem:[%s3960_s15 + $0x10] sm:$0xff] %vm1864_vm2, %v808_v61  ;;  %v3349_v1 = vmul.f32 %v3326_v53, %v807_v62  ;;  %v1044_v3 = vmax.f32 %v3337_v60, %v3172_v50 }
 0x339   :  { %1866 = vst.msk [vmem:[%s3960_s15 + $0x8] sm:$0xff] %vm1864_vm2, %v807_v62  ;;  %v766_v4 = vpop.xlane.xlu1 %765  ;;  %v769_v6 = vpop.xlane.xlu0 %768 }
 0x33a   :  { %v3358_v8 = vsub.f32 0.0, %v3342_v0  ;;  %v3361_v9 = vsub.f32 0.0, %v3349_v1  ;;  %v809_v10 = vadd.f32 %v3324_v55, %v766_v4  ;;  %v810_v11 = vadd.f32 %v3324_v55, %v769_v6 }
 0x33b   :  { %v1060_v12 = vmin.f32 %v3334_v56, %v1044_v3 }
 0x33c   :  { %3981 = vst [vmem:[#allocation8_spill] sm:$0xff] %v3358_v8  ;;  %3982 = vst [vmem:[#allocation9_spill] sm:$0xff] %v3361_v9  ;;  %v3367_v13 = vmul.f32 %v3326_v53, %v809_v10  ;;  %v3374_v14 = vmul.f32 %v3326_v53, %v810_v11  ;;  %v1045_v15 = vmax.f32 %v3361_v9, %v3164_v47 }
 0x33d   :  { %1868 = vst.msk [vmem:[%s3960_s15 + $0x18] sm:$0xff] %vm1864_vm2, %v809_v10  ;;  %1869 = vst.msk [vmem:[%s3960_s15 + $0x20] sm:$0xff] %vm1864_vm2, %v810_v11  ;;  %v1046_v31 = vmax.f32 %v3358_v8, %v3188_v20  ;;  %v772_v32 = vpop.xlane.xlu1 %771  ;;  %v775_v33 = vpop.xlane.xlu0 %774  ;;  %v1076_v34 = vsub.f32 %v3172_v50, %v1060_v12 }
 0x33e   :  { %v3386_v35 = vsub.f32 0.0, %v3367_v13  ;;  %v3389_v29 = vsub.f32 0.0, %v3374_v14  ;;  %v811_v36 = vadd.f32 %v3324_v55, %v772_v32  ;;  %v812_v38 = vadd.f32 %v3324_v55, %v775_v33 }
 0x33f   :  { %2365 = vmatprep.mubr.f32.mxu1 %v1076_v34  ;;  %v1061_v39 = vmin.f32 %v3349_v1, %v1045_v15  ;;  %v1062_v40 = vmin.f32 %v3342_v0, %v1046_v31 }
 0x340   :  { %3983 = vst [vmem:[#allocation10_spill] sm:$0xff] %v3386_v35  ;;  %v3396_v37 = vmul.f32 %v3326_v53, %v811_v36  ;;  %1870 = vst.msk [vmem:[%s3960_s15 + $0x28] sm:$0xff] %vm1864_vm2, %v811_v36  ;;  %v3403_v45 = vmul.f32 %v3326_v53, %v812_v38  ;;  %v1047_v48 = vmax.f32 %v3386_v35, %v3180_v16 }
 0x341   :  { %1871 = vst.msk [vmem:[%s3960_s15 + $0x30] sm:$0xff] %vm1864_vm2, %v812_v38  ;;  %v1048_v49 = vmax.f32 %v3389_v29, %v3198_v23  ;;  %v778_v17 = vpop.xlane.xlu1 %777  ;;  %v781_v18 = vpop.xlane.xlu0 %780  ;;  %v1077_v30 = vsub.f32 %v3164_v47, %v1061_v39  ;;  %v1078_v52 = vsub.f32 %v3188_v20, %v1062_v40 }
 0x342   :  { %v3416_v54 = vsub.f32 0.0, %v3396_v37  ;;  %v3419_v58 = vsub.f32 0.0, %v3403_v45  ;;  %v813_v59 = vadd.f32 %v3324_v55, %v778_v17  ;;  %v814_v61 = vadd.f32 %v3324_v55, %v781_v18 }
 0x343   :  { %2366 = vmatmul.mubr.f32.vlgmr.msra.gmra.mrb[32].mxu1 %v1077_v30  ;;  %v1063_v62 = vmin.f32 %v3367_v13, %v1047_v48  ;;  %v1064_v3 = vmin.f32 %v3374_v14, %v1048_v49 }
 0x344   :  { %v3426_v4 = vmul.f32 %v3326_v53, %v813_v59  ;;  %1872 = vst.msk [vmem:[%s3960_s15 + $0x38] sm:$0xff] %vm1864_vm2, %v813_v59  ;;  %v3433_v6 = vmul.f32 %v3326_v53, %v814_v61  ;;  %1873 = vst.msk [vmem:[%s3960_s15 + $0x40] sm:$0xff] %vm1864_vm2, %v814_v61  ;;  %2368 = vmatprep.mubr.f32.mxu1 %v1078_v52  ;;  %v1049_v10 = vmax.f32 %v3416_v54, %v3196_v22 }
 0x345   :  { %v1050_v11 = vmax.f32 %v3419_v58, %v3206_v25  ;;  %v784_v12 = vpop.xlane.xlu1 %783  ;;  %v787_v15 = vpop.xlane.xlu0 %786  ;;  %v1079_v31 = vsub.f32 %v3180_v16, %v1063_v62  ;;  %v1080_v32 = vsub.f32 %v3198_v23, %v1064_v3  ;;  %2672 = vmatpush3.bf16.msra.mxu1 %v3143_v42 }
 0x346   :  { %v3447_v33 = vsub.f32 0.0, %v3426_v4  ;;  %v3450_v34 = vsub.f32 0.0, %v3433_v6  ;;  %v815_v36 = vadd.f32 %v3324_v55, %v784_v12  ;;  %v816_v38 = vadd.f32 %v3324_v55, %v787_v15  ;;  %2674 = vmatprep.subr.bf16.mxu1 %v3148_v43 }
 0x347   :  { %2369 = vmatmul.mubr.f32.gmra.mrb[34].mxu1 %v1079_v31  ;;  %v1065_v39 = vmin.f32 %v3396_v37, %v1049_v10  ;;  %v1066_v40 = vmin.f32 %v3403_v45, %v1050_v11 }
 0x348   :  { %v3458_v48 = vmul.f32 %v3326_v53, %v815_v36  ;;  %1874 = vst.msk [vmem:[%s3960_s15 + $0x48] sm:$0xff] %vm1864_vm2, %v815_v36  ;;  %v3465_v42 = vmul.f32 %v3326_v53, %v816_v38  ;;  %1875 = vst.msk [vmem:[%s3960_s15 + $0x50] sm:$0xff] %vm1864_vm2, %v816_v38  ;;  %2371 = vmatprep.mubr.f32.mxu1 %v1080_v32  ;;  %v1051_v49 = vmax.f32 %v3447_v33, %v3204_v24 }
 0x349   :  { %v1052_v17 = vmax.f32 %v3450_v34, %v3212_v27  ;;  %v790_v18 = vpop.xlane.xlu1 %789  ;;  %v793_v30 = vpop.xlane.xlu0 %792  ;;  %v1081_v52 = vsub.f32 %v3196_v22, %v1065_v39  ;;  %v1082_v59 = vsub.f32 %v3206_v25, %v1066_v40  ;;  %2676 = vmatpush3.bf16.msra.mxu1 %v3148_v43 }
 0x34a   :  { %v3479_v61 = vsub.f32 0.0, %v3458_v48  ;;  %v3482_v62 = vsub.f32 0.0, %v3465_v42  ;;  %v817_v3 = vadd.f32 %v3324_v55, %v790_v18  ;;  %v818_v10 = vadd.f32 %v3324_v55, %v793_v30  ;;  %2678 = vmatprep.subr.bf16.mxu1 %v3161_v46 }
 0x34b   :  { %2372 = vmatmul.mubr.f32.gmra.mrb[36].mxu1 %v1081_v52  ;;  %v1067_v11 = vmin.f32 %v3426_v4, %v1051_v49  ;;  %v1068_v12 = vmin.f32 %v3433_v6, %v1052_v17 }
 0x34c   :  { %v3490_v15 = vmul.f32 %v3326_v53, %v817_v3  ;;  %1876 = vst.msk [vmem:[%s3960_s15 + $0x58] sm:$0xff] %vm1864_vm2, %v817_v3  ;;  %v3497_v43 = vmul.f32 %v3326_v53, %v818_v10  ;;  %1877 = vst.msk [vmem:[%s3960_s15 + $0x60] sm:$0xff] %vm1864_vm2, %v818_v10  ;;  %2374 = vmatprep.mubr.f32.mxu1 %v1082_v59  ;;  %v1053_v31 = vmax.f32 %v3479_v61, %v3210_v26 }
 0x34d   :  { %v1054_v32 = vmax.f32 %v3482_v62, %v3254_v57  ;;  %v796_v36 = vpop.xlane.xlu1 %795  ;;  %v799_v38 = vpop.xlane.xlu0 %798  ;;  %v1083_v39 = vsub.f32 %v3204_v24, %v1067_v11  ;;  %v1084_v40 = vsub.f32 %v3212_v27, %v1068_v12  ;;  %2680 = vmatpush3.bf16.msra.mxu1 %v3161_v46 }
 0x34e   :  { %v3511_v49 = vsub.f32 0.0, %v3490_v15  ;;  %v3514_v17 = vsub.f32 0.0, %v3497_v43  ;;  %v819_v18 = vadd.f32 %v3324_v55, %v796_v36  ;;  %v820_v30 = vadd.f32 %v3324_v55, %v799_v38  ;;  %2682 = vmatprep.subr.bf16.mxu1 %v3177_v51 }
 0x34f   :  { %2375 = vmatmul.mubr.f32.gmra.mrb[38].mxu1 %v1083_v39  ;;  %v1069_v52 = vmin.f32 %v3458_v48, %v1053_v31  ;;  %v1070_v59 = vmin.f32 %v3465_v42, %v1054_v32 }
 0x350   :  { %v3522_v3 = vmul.f32 %v3326_v53, %v819_v18  ;;  %1878 = vst.msk [vmem:[%s3960_s15 + $0x68] sm:$0xff] %vm1864_vm2, %v819_v18  ;;  %v3529_v46 = vmul.f32 %v3326_v53, %v820_v30  ;;  %1879 = vst.msk [vmem:[%s3960_s15 + $0x70] sm:$0xff] %vm1864_vm2, %v820_v30  ;;  %2377 = vmatprep.mubr.f32.mxu1 %v1084_v40  ;;  %v1055_v10 = vmax.f32 %v3511_v49, %v3214_v28 }
 0x351   :  { %v1056_v11 = vmax.f32 %v3514_v17, %v3262_v2  ;;  %v802_v12 = vpop.xlane.xlu1 %801  ;;  %v1085_v31 = vsub.f32 %v3210_v26, %v1069_v52  ;;  %v1086_v32 = vsub.f32 %v3254_v57, %v1070_v59  ;;  %2684 = vmatpush3.bf16.msra.mxu1 %v3177_v51 }
 0x352   :  { %3984 = vst [vmem:[#allocation11_spill] sm:$0xff] %v3529_v46  ;;  %v3543_v36 = vsub.f32 0.0, %v3522_v3  ;;  %v3546_v38 = vsub.f32 0.0, %v3529_v46  ;;  %v821_v39 = vadd.f32 %v3324_v55, %v802_v12  ;;  %v1071_v40 = vmin.f32 %v3490_v15, %v1055_v10  ;;  %2686 = vmatprep.subr.bf16.mxu1 %v3193_v21 }
 0x353   :  { %2378 = vmatmul.mubr.f32.gmra.mrb[40].mxu1 %v1085_v31  ;;  %v1072_v18 = vmin.f32 %v3497_v43, %v1056_v11 }
 0x354   :  { %3985 = vst [vmem:[#allocation12_spill] sm:$0xff] %v3546_v38  ;;  %v3553_v30 = vmul.f32 %v3326_v53, %v821_v39  ;;  %1880 = vst.msk [vmem:[%s3960_s15 + $0x78] sm:$0xff] %vm1864_vm2, %v821_v39  ;;  %2380 = vmatprep.mubr.f32.mxu1 %v1086_v32  ;;  %v1087_v51 = vsub.f32 %v3214_v28, %v1071_v40  ;;  %v1057_v55 = vmax.f32 %v3543_v36, %v3259_v63 }
 0x355   :  { %v1058_v52 = vmax.f32 %v3546_v38, %v3269_v7  ;;  %v1088_v59 = vsub.f32 %v3262_v2, %v1072_v18  ;;  %2688 = vmatpush3.bf16.msra.mxu1 %v3193_v21  ;;  %v3585_v18 = vmul.f32 %v3164_v47, %v3326_v53  ;;  %v3600_v47 = vmul.f32 %v3188_v20, %v3326_v53 }
 0x356   :  { %3986 = vst [vmem:[#allocation13_spill] sm:$0xff] %v3553_v30  ;;  %v3567_v10 = vsub.f32 0.0, %v3553_v30  ;;  %v1073_v11 = vmin.f32 %v3522_v3, %v1057_v55  ;;  %2690 = vmatprep.subr.bf16.mxu1 %v3291_v41  ;;  %v3614_v20 = vmul.f32 %v3198_v23, %v3326_v53 }
 0x357   :  { %v1074_v12 = vmin.f32 %v3529_v46, %v1058_v52  ;;  %2381 = vmatmul.mubr.f32.gmra.mrb[42].mxu1 %v1087_v51  ;;  %3988 = vst [vmem:[#allocation15_spill] sm:$0xff] %v3585_v18  ;;  %3991 = vst [vmem:[#allocation18_spill] sm:$0xff] %v3600_v47 }
 0x358   :  { %3987 = vst [vmem:[#allocation14_spill] sm:$0xff] %v3567_v10  ;;  %2383 = vmatprep.mubr.f32.mxu1 %v1088_v59  ;;  %v1089_v31 = vsub.f32 %v3259_v63, %v1073_v11  ;;  %v1059_v39 = vmax.f32 %v3567_v10, %v3266_v5 }
 0x359   :  { %v1090_v32 = vsub.f32 %v3269_v7, %v1074_v12  ;;  %2692 = vmatpush3.bf16.msra.mxu1 %v3291_v41  ;;  %v3589_v41 = vmul.f32 %v3172_v50, %v3326_v53 }
 0x35a   :  { %v1075_v21 = vmin.f32 %v3553_v30, %v1059_v39  ;;  %2694 = vmatprep.subr.bf16.mxu1 %v3294_v44 }
 0x35b   :  { %2384 = vmatmul.mubr.f32.gmra.mrb[44].mxu1 %v1089_v31  ;;  %3989 = vst [vmem:[#allocation16_spill] sm:$0xff] %v3589_v41 }
 0x35c   :  { %2386 = vmatprep.mubr.f32.mxu1 %v1090_v32  ;;  %v1091_v40 = vsub.f32 %v3266_v5, %v1075_v21 }
 0x35d   :  { %2696 = vmatpush3.bf16.msra.mxu1 %v3294_v44  ;;  %v3595_v44 = vmul.f32 %v3180_v16, %v3326_v53  ;;  %v3609_v16 = vmul.f32 %v3196_v22, %v3326_v53 }
 0x35e   :  { %2698 = vmatprep.subr.bf16.mxu1 %v3309_v19 }
 0x35f   :  { %2387 = vmatmul.mubr.f32.gmra.mrb[46].mxu1 %v1091_v40  ;;  %3990 = vst [vmem:[#allocation17_spill] sm:$0xff] %v3595_v44 }
 0x361   :  { %2700 = vmatpush3.bf16.msra.mxu1 %v3309_v19 }
 0x416   :  { %v2367_v51 = vpop.f32.mrb[32].mxu1 }
 0x417   :  { %v1164_v55 = vadd.f32 %v2367_v51, %v3585_v18  ;;  %v1158_v52 = vpop.f32.mrb[33].mxu1 }
 0x418   :  { %v1159_v59 = vadd.f32 %v1158_v52, %v3589_v41 }
 0x419   :  { %v1238_v19 = vmax.f32 %v3361_v9, %v1164_v55 }
 0x41a   :  { %v1237_v11 = vmax.f32 %v3337_v60, %v1159_v59  ;;  %v2370_v50 = vpop.f32.mrb[34].mxu1 }
 0x41b   :  { %v1254_v12 = vmin.f32 %v3349_v1, %v1238_v19  ;;  %v1174_v31 = vadd.f32 %v2370_v50, %v3595_v44  ;;  %v1168_v32 = vpop.f32.mrb[35].mxu1 }
 0x41c   :  { %v1253_v39 = vmin.f32 %v3334_v56, %v1237_v11  ;;  %v1169_v21 = vadd.f32 %v1168_v32, %v3600_v47 }
 0x41d   :  { %v1240_v40 = vmax.f32 %v3386_v35, %v1174_v31  ;;  %v1270_v50 = vsub.f32 %v1164_v55, %v1254_v12  ;;  %v3623_v35 = vmul.f32 %v3204_v24, %v3326_v53  ;;  %v3628_v55 = vmul.f32 %v3206_v25, %v3326_v53 }
 0x41e   :  { %v1269_v51 = vsub.f32 %v1159_v59, %v1253_v39  ;;  %v1239_v52 = vmax.f32 %v3358_v8, %v1169_v21  ;;  %v2373_v19 = vpop.f32.mrb[36].mxu1 }
 0x41f   :  { %v1256_v44 = vmin.f32 %v3367_v13, %v1240_v40  ;;  %v1184_v11 = vadd.f32 %v2373_v19, %v3609_v16  ;;  %v1178_v32 = vpop.f32.mrb[37].mxu1 }
 0x420   :  { %v1255_v47 = vmin.f32 %v3342_v0, %v1239_v52  ;;  %v1179_v22 = vadd.f32 %v1178_v32, %v3614_v20  ;;  %2421 = vmatprep.mubr.f32.mxu0 %v1269_v51 }
 0x421   :  { %v1242_v23 = vmax.f32 %v3416_v54, %v1184_v11  ;;  %2422 = vmatmul.mubr.f32.vlgmr.msra.gmra.mrb[32].mxu0 %v1270_v50  ;;  %v1272_v40 = vsub.f32 %v1174_v31, %v1256_v44  ;;  %v3637_v50 = vmul.f32 %v3210_v26, %v3326_v53  ;;  %v3642_v44 = vmul.f32 %v3212_v27, %v3326_v53 }
 0x422   :  { %v1271_v59 = vsub.f32 %v1169_v21, %v1255_v47  ;;  %v1241_v12 = vmax.f32 %v3389_v29, %v1179_v22  ;;  %v2376_v39 = vpop.f32.mrb[38].mxu1 }
 0x423   :  { %v1258_v52 = vmin.f32 %v3396_v37, %v1242_v23  ;;  %v1194_v51 = vadd.f32 %v2376_v39, %v3623_v35  ;;  %v1188_v19 = vpop.f32.mrb[39].mxu1 }
 0x424   :  { %v1257_v24 = vmin.f32 %v3374_v14, %v1241_v12  ;;  %v1189_v32 = vadd.f32 %v1188_v19, %v3628_v55  ;;  %2424 = vmatprep.mubr.f32.mxu0 %v1271_v59 }
 0x425   :  { %v1244_v25 = vmax.f32 %v3447_v33, %v1194_v51  ;;  %2425 = vmatmul.mubr.f32.gmra.mrb[34].mxu0 %v1272_v40  ;;  %v1274_v23 = vsub.f32 %v1184_v11, %v1258_v52  ;;  %v3651_v40 = vmul.f32 %v3214_v28, %v3326_v53  ;;  %v3656_v11 = vmul.f32 %v3254_v57, %v3326_v53 }
 0x426   :  { %v1273_v47 = vsub.f32 %v1179_v22, %v1257_v24  ;;  %v1243_v31 = vmax.f32 %v3419_v58, %v1189_v32  ;;  %v2379_v21 = vpop.f32.mrb[40].mxu1 }
 0x427   :  { %v1260_v12 = vmin.f32 %v3426_v4, %v1244_v25  ;;  %v1204_v59 = vadd.f32 %v2379_v21, %v3637_v50  ;;  %v1198_v39 = vpop.f32.mrb[41].mxu1 }
 0x428   :  { %v1259_v26 = vmin.f32 %v3403_v45, %v1243_v31  ;;  %v1199_v19 = vadd.f32 %v1198_v39, %v3642_v44  ;;  %2427 = vmatprep.mubr.f32.mxu0 %v1273_v47 }
 0x429   :  { %v1246_v27 = vmax.f32 %v3479_v61, %v1204_v59  ;;  %2428 = vmatmul.mubr.f32.gmra.mrb[36].mxu0 %v1274_v23  ;;  %v1276_v25 = vsub.f32 %v1194_v51, %v1260_v12  ;;  %v3665_v23 = vmul.f32 %v3259_v63, %v3326_v53  ;;  %v3670_v51 = vmul.f32 %v3262_v2, %v3326_v53 }
 0x42a   :  { %v1275_v22 = vsub.f32 %v1189_v32, %v1259_v26  ;;  %v1245_v52 = vmax.f32 %v3450_v34, %v1199_v19  ;;  %v2382_v24 = vpop.f32.mrb[42].mxu1 }
 0x42b   :  { %v1262_v31 = vmin.f32 %v3458_v48, %v1246_v27  ;;  %v1214_v47 = vadd.f32 %v2382_v24, %v3651_v40  ;;  %v1208_v21 = vpop.f32.mrb[43].mxu1 }
 0x42c   :  { %v1261_v28 = vmin.f32 %v3433_v6, %v1245_v52  ;;  %v1209_v39 = vadd.f32 %v1208_v21, %v3656_v11  ;;  %2430 = vmatprep.mubr.f32.mxu0 %v1275_v22 }
 0x42d   :  { %v1248_v57 = vmax.f32 %v3511_v49, %v1214_v47  ;;  %2431 = vmatmul.mubr.f32.gmra.mrb[38].mxu0 %v1276_v25  ;;  %v1278_v27 = vsub.f32 %v1204_v59, %v1262_v31  ;;  %v3679_v25 = vmul.f32 %v3266_v5, %v3326_v53  ;;  %v3684_v59 = vmul.f32 %v3269_v7, %v3326_v53 }
 0x42e   :  { %v1277_v32 = vsub.f32 %v1199_v19, %v1261_v28  ;;  %v1247_v12 = vmax.f32 %v3482_v62, %v1209_v39  ;;  %v2385_v26 = vpop.f32.mrb[44].mxu1 }
 0x42f   :  { %v1264_v52 = vmin.f32 %v3490_v15, %v1248_v57  ;;  %v1224_v22 = vadd.f32 %v2385_v26, %v3665_v23  ;;  %v1218_v24 = vpop.f32.mrb[45].mxu1 }
 0x430   :  { %v1263_v63 = vmin.f32 %v3465_v42, %v1247_v12  ;;  %v1219_v21 = vadd.f32 %v1218_v24, %v3670_v51  ;;  %2433 = vmatprep.mubr.f32.mxu0 %v1277_v32 }
 0x431   :  { %v1250_v2 = vmax.f32 %v3543_v36, %v1224_v22  ;;  %2434 = vmatmul.mubr.f32.gmra.mrb[40].mxu0 %v1278_v27  ;;  %v1280_v57 = vsub.f32 %v1214_v47, %v1264_v52 }
 0x432   :  { %v1279_v19 = vsub.f32 %v1209_v39, %v1263_v63  ;;  %v1249_v31 = vmax.f32 %v3514_v17, %v1219_v21  ;;  %v2388_v28 = vpop.f32.mrb[46].mxu1 }
 0x433   :  { %v1266_v12 = vmin.f32 %v3522_v3, %v1250_v2  ;;  %v1234_v32 = vadd.f32 %v2388_v28, %v3679_v25  ;;  %v1228_v26 = vpop.f32.mrb[47].mxu1  ;;  %v1674_v28 = vld [vmem:[%s3955_s10 + $0x18] sm:$0xff] }
 0x434   :  { %v1265_v5 = vmin.f32 %v3497_v43, %v1249_v31  ;;  %v1229_v24 = vadd.f32 %v1228_v26, %v3684_v59  ;;  %2436 = vmatprep.mubr.f32.mxu0 %v1279_v19  ;;  %v1671_v19 = vld [vmem:[%s3955_s10] sm:$0xff] }
 0x435   :  { %v1252_v27 = vmax.f32 %v3567_v10, %v1234_v32  ;;  %2437 = vmatmul.mubr.f32.gmra.mrb[42].mxu0 %v1280_v57  ;;  %v1282_v39 = vsub.f32 %v1224_v22, %v1266_v12  ;;  %v1673_v22 = vld [vmem:[%s3955_s10 + $0x10] sm:$0xff]  ;;  %v1675_v12 = vld [vmem:[%s3955_s10 + $0x20] sm:$0xff] }
 0x436   :  { %v1281_v7 = vsub.f32 %v1219_v21, %v1265_v5  ;;  %v1251_v53 = vmax.f32 %v3546_v38, %v1229_v24  ;;  %v1672_v21 = vld [vmem:[%s3955_s10 + $0x8] sm:$0xff]  ;;  %v3707_v57 = vpack.c.bf16 %v1674_v28, %v1673_v22  ;;  %v1677_v5 = vld [vmem:[%s3955_s10 + $0x30] sm:$0xff] }
 0x437   :  { %v1268_v63 = vmin.f32 %v3553_v30, %v1252_v27  ;;  %v2701_v31 = vpack.c.bf16 %v1672_v21, %v1671_v19  ;;  %v3994_v30 = vld [vmem:[#allocation10_spill] sm:$0xff] }
 0x438   :  { %v1267_v47 = vmin.f32 %v3529_v46, %v1251_v53  ;;  %2439 = vmatprep.mubr.f32.mxu0 %v1281_v7  ;;  %v1679_v7 = vld [vmem:[%s3955_s10 + $0x40] sm:$0xff]  ;;  %v1680_v53 = vld [vmem:[%s3955_s10 + $0x48] sm:$0xff] }
 0x439   :  { %2440 = vmatmul.mubr.f32.gmra.mrb[44].mxu0 %v1282_v39  ;;  %v1284_v2 = vsub.f32 %v1234_v32, %v1268_v63  ;;  %v1676_v32 = vld [vmem:[%s3955_s10 + $0x28] sm:$0xff]  ;;  %2702 = vmatprep.subr.bf16.mxu0 %v2701_v31  ;;  %v3736_v39 = vpack.c.bf16 %v1680_v53, %v1679_v7  ;;  %v1681_v63 = vld [vmem:[%s3955_s10 + $0x50] sm:$0xff] }
 0x43a   :  { %v1283_v52 = vsub.f32 %v1229_v24, %v1267_v47  ;;  %2733 = vmatprep.subr.bf16.mxu1 %v2701_v31  ;;  %2704 = vmatpush3.bf16.msra.mxu0 %v2701_v31  ;;  %v3716_v26 = vpack.c.bf16 %v1676_v32, %v1675_v12  ;;  %v1678_v24 = vld [vmem:[%s3955_s10 + $0x38] sm:$0xff] }
 0x43b   :  { %2706 = vmatprep.subr.bf16.mxu0 %v3707_v57  ;;  %v3726_v27 = vpack.c.bf16 %v1678_v24, %v1677_v5  ;;  %v1682_v47 = vld [vmem:[%s3955_s10 + $0x58] sm:$0xff]  ;;  %v3992_v24 = vld [vmem:[#allocation17_spill] sm:$0xff] }
 0x43c   :  { %2442 = vmatprep.mubr.f32.mxu0 %v1283_v52  ;;  %v3746_v52 = vpack.c.bf16 %v1682_v47, %v1681_v63  ;;  %v3993_v47 = vld [vmem:[#allocation18_spill] sm:$0xff] }
 0x43d   :  { %2443 = vmatmul.mubr.f32.gmra.mrb[46].mxu0 %v1284_v2 }
 0x43e   :  { %2708 = vmatpush3.bf16.msra.mxu0 %v3707_v57 }
 0x43f   :  { %2710 = vmatprep.subr.bf16.mxu0 %v3716_v26 }
 0x442   :  { %2712 = vmatpush3.bf16.msra.mxu0 %v3716_v26 }
 0x443   :  { %2714 = vmatprep.subr.bf16.mxu0 %v3726_v27 }
 0x446   :  { %2716 = vmatpush3.bf16.msra.mxu0 %v3726_v27 }
 0x447   :  { %2718 = vmatprep.subr.bf16.mxu0 %v3736_v39 }
 0x44a   :  { %2720 = vmatpush3.bf16.msra.mxu0 %v3736_v39 }
 0x44b   :  { %2722 = vmatprep.subr.bf16.mxu0 %v3746_v52 }
 0x44e   :  { %2724 = vmatpush3.bf16.msra.mxu0 %v3746_v52 }
 0x4f4   :  { %v2423_v2 = vpop.f32.mrb[32].mxu0 }
 0x4f5   :  { %v1357_v19 = vadd.f32 %v2423_v2, %v3585_v18  ;;  %v1351_v21 = vpop.f32.mrb[33].mxu0 }
 0x4f6   :  { %v1352_v22 = vadd.f32 %v1351_v21, %v3589_v41 }
 0x4f7   :  { %v1431_v28 = vmax.f32 %v3361_v9, %v1357_v19 }
 0x4f8   :  { %v1430_v12 = vmax.f32 %v3337_v60, %v1352_v22  ;;  %v2426_v32 = vpop.f32.mrb[34].mxu0 }
 0x4f9   :  { %v1447_v5 = vmin.f32 %v3349_v1, %v1431_v28  ;;  %v1367_v7 = vadd.f32 %v2426_v32, %v3992_v24  ;;  %v1361_v53 = vpop.f32.mrb[35].mxu0 }
 0x4fa   :  { %v1446_v63 = vmin.f32 %v3334_v56, %v1430_v12  ;;  %v1362_v46 = vadd.f32 %v1361_v53, %v3993_v47 }
 0x4fb   :  { %v1433_v38 = vmax.f32 %v3994_v30, %v1367_v7  ;;  %v1463_v41 = vsub.f32 %v1357_v19, %v1447_v5 }
 0x4fc   :  { %v1462_v2 = vsub.f32 %v1352_v22, %v1446_v63  ;;  %v1432_v18 = vmax.f32 %v3358_v8, %v1362_v46  ;;  %v2429_v21 = vpop.f32.mrb[36].mxu0 }
 0x4fd   :  { %v1449_v9 = vmin.f32 %v3367_v13, %v1433_v38  ;;  %v1377_v60 = vadd.f32 %v2429_v21, %v3609_v16  ;;  %v1371_v10 = vpop.f32.mrb[37].mxu0 }
 0x4fe   :  { %v1448_v28 = vmin.f32 %v3342_v0, %v1432_v18  ;;  %v1372_v32 = vadd.f32 %v1371_v10, %v3614_v20  ;;  %2477 = vmatprep.mubr.f32.mxu1 %v1462_v2 }
 0x4ff   :  { %v1435_v12 = vmax.f32 %v3416_v54, %v1377_v60  ;;  %2478 = vmatmul.mubr.f32.vlgmr.msra.gmra.mrb[48].mxu1 %v1463_v41  ;;  %v1465_v8 = vsub.f32 %v1367_v7, %v1449_v9 }
 0x500   :  { %v1464_v53 = vsub.f32 %v1362_v46, %v1448_v28  ;;  %v1434_v22 = vmax.f32 %v3389_v29, %v1372_v32  ;;  %v2432_v63 = vpop.f32.mrb[38].mxu0  ;;  %2741 = vmatpush3.bf16.msra.mxu1 %v2701_v31 }
 0x501   :  { %v1451_v19 = vmin.f32 %v3396_v37, %v1435_v12  ;;  %v1387_v38 = vadd.f32 %v2432_v63, %v3623_v35  ;;  %v1381_v5 = vpop.f32.mrb[39].mxu0  ;;  %2734 = vmatprep.subr.bf16.mxu1 %v3707_v57 }
 0x502   :  { %v1450_v18 = vmin.f32 %v3374_v14, %v1434_v22  ;;  %v1382_v10 = vadd.f32 %v1381_v5, %v3628_v55  ;;  %2480 = vmatprep.mubr.f32.mxu1 %v1464_v53 }
 0x503   :  { %v1437_v41 = vmax.f32 %v3447_v33, %v1387_v38  ;;  %2481 = vmatmul.mubr.f32.gmra.mrb[50].mxu1 %v1465_v8  ;;  %v1467_v9 = vsub.f32 %v1377_v60, %v1451_v19 }
 0x504   :  { %v1466_v46 = vsub.f32 %v1372_v32, %v1450_v18  ;;  %v1436_v2 = vmax.f32 %v3419_v58, %v1382_v10  ;;  %v2435_v31 = vpop.f32.mrb[40].mxu0  ;;  %2742 = vmatpush3.bf16.msra.mxu1 %v3707_v57 }
 0x505   :  { %v1453_v7 = vmin.f32 %v3426_v4, %v1437_v41  ;;  %v1397_v21 = vadd.f32 %v2435_v31, %v3637_v50  ;;  %v1391_v28 = vpop.f32.mrb[41].mxu0  ;;  %2735 = vmatprep.subr.bf16.mxu1 %v3716_v26 }
 0x506   :  { %v1452_v12 = vmin.f32 %v3403_v45, %v1436_v2  ;;  %v1392_v53 = vadd.f32 %v1391_v28, %v3642_v44  ;;  %2483 = vmatprep.mubr.f32.mxu1 %v1466_v46 }
 0x507   :  { %v1439_v8 = vmax.f32 %v3479_v61, %v1397_v21  ;;  %2484 = vmatmul.mubr.f32.gmra.mrb[52].mxu1 %v1467_v9  ;;  %v1469_v60 = vsub.f32 %v1387_v38, %v1453_v7 }
 0x508   :  { %v1468_v32 = vsub.f32 %v1382_v10, %v1452_v12  ;;  %v1438_v22 = vmax.f32 %v3450_v34, %v1392_v53  ;;  %v2438_v57 = vpop.f32.mrb[42].mxu0  ;;  %2743 = vmatpush3.bf16.msra.mxu1 %v3716_v26 }
 0x509   :  { %v1455_v63 = vmin.f32 %v3458_v48, %v1439_v8  ;;  %v1407_v19 = vadd.f32 %v2438_v57, %v3651_v40  ;;  %v1401_v5 = vpop.f32.mrb[43].mxu0  ;;  %2736 = vmatprep.subr.bf16.mxu1 %v3726_v27 }
 0x50a   :  { %v1454_v18 = vmin.f32 %v3433_v6, %v1438_v22  ;;  %v1402_v41 = vadd.f32 %v1401_v5, %v3656_v11  ;;  %2486 = vmatprep.mubr.f32.mxu1 %v1468_v32 }
 0x50b   :  { %v1441_v10 = vmax.f32 %v3511_v49, %v1407_v19  ;;  %2487 = vmatmul.mubr.f32.gmra.mrb[54].mxu1 %v1469_v60  ;;  %v1471_v38 = vsub.f32 %v1397_v21, %v1455_v63 }
 0x50c   :  { %v1470_v46 = vsub.f32 %v1392_v53, %v1454_v18  ;;  %v1440_v2 = vmax.f32 %v3482_v62, %v1402_v41  ;;  %v2441_v26 = vpop.f32.mrb[44].mxu0  ;;  %2744 = vmatpush3.bf16.msra.mxu1 %v3726_v27  ;;  %v3995_v18 = vld [vmem:[#allocation14_spill] sm:$0xff] }
 0x50d   :  { %v1457_v31 = vmin.f32 %v3490_v15, %v1441_v10  ;;  %v1417_v9 = vadd.f32 %v2441_v26, %v3665_v23  ;;  %v1411_v7 = vpop.f32.mrb[45].mxu0  ;;  %2737 = vmatprep.subr.bf16.mxu1 %v3736_v39 }
 0x50e   :  { %v1456_v28 = vmin.f32 %v3465_v42, %v1440_v2  ;;  %v1412_v12 = vadd.f32 %v1411_v7, %v3670_v51  ;;  %2489 = vmatprep.mubr.f32.mxu1 %v1470_v46  ;;  %v3996_v46 = vld [vmem:[#allocation12_spill] sm:$0xff] }
 0x50f   :  { %v1443_v53 = vmax.f32 %v3543_v36, %v1417_v9  ;;  %2490 = vmatmul.mubr.f32.gmra.mrb[56].mxu1 %v1471_v38  ;;  %v1473_v21 = vsub.f32 %v1407_v19, %v1457_v31  ;;  %v3997_v19 = vld [vmem:[#allocation13_spill] sm:$0xff]  ;;  %v3998_v38 = vld [vmem:[#allocation11_spill] sm:$0xff] }
 0x510   :  { %v1472_v8 = vsub.f32 %v1402_v41, %v1456_v28  ;;  %v1442_v32 = vmax.f32 %v3514_v17, %v1412_v12  ;;  %v2444_v27 = vpop.f32.mrb[46].mxu0  ;;  %2745 = vmatpush3.bf16.msra.mxu1 %v3736_v39 }
 0x511   :  { %v1459_v22 = vmin.f32 %v3522_v3, %v1443_v53  ;;  %v1427_v57 = vadd.f32 %v2444_v27, %v3679_v25  ;;  %v1421_v60 = vpop.f32.mrb[47].mxu0  ;;  %2738 = vmatprep.subr.bf16.mxu1 %v3746_v52  ;;  %v1683_v53 = vld [vmem:[%s3955_s10 + $0x60] sm:$0xff] }
 0x512   :  { %v1458_v63 = vmin.f32 %v3497_v43, %v1442_v32  ;;  %v1422_v5 = vadd.f32 %v1421_v60, %v3684_v59  ;;  %2492 = vmatprep.mubr.f32.mxu1 %v1472_v8  ;;  %v1686_v8 = vld [vmem:[%s3955_s10 + $0x78] sm:$0xff]  ;;  %v4000_v60 = vld [vmem:[#allocation16_spill] sm:$0xff] }
 0x513   :  { %v1445_v41 = vmax.f32 %v3995_v18, %v1427_v57  ;;  %2493 = vmatmul.mubr.f32.gmra.mrb[58].mxu1 %v1473_v21  ;;  %v1475_v39 = vsub.f32 %v1417_v9, %v1459_v22  ;;  %v1685_v9 = vld [vmem:[%s3955_s10 + $0x70] sm:$0xff]  ;;  %v3999_v21 = vld [vmem:[#allocation15_spill] sm:$0xff] }
 0x514   :  { %v1474_v10 = vsub.f32 %v1412_v12, %v1458_v63  ;;  %v1444_v2 = vmax.f32 %v3996_v46, %v1422_v5  ;;  %2746 = vmatpush3.bf16.msra.mxu1 %v3746_v52  ;;  %v1684_v12 = vld [vmem:[%s3955_s10 + $0x68] sm:$0xff]  ;;  %v2729_v32 = vpack.c.bf16 %v1686_v8, %v1685_v9  ;;  %s2780_s10 = smov [#allocation4]  }
 0x515   :  { %v1461_v26 = vmin.f32 %v3997_v19, %v1445_v41  ;;  %v2725_v52 = vpack.c.bf16 %v1684_v12, %v1683_v53  ;;  %v4003_v8 = vld [vmem:[#allocation8_spill] sm:$0xff]  ;;  %s1888_s4 = sshll.u32 %s2780_s10, 4  ;;  %s1889_s4 = int_to_ptr.vmem [resolvable:$true] %s1888_s4 }
 0x516   :  { %v1460_v31 = vmin.f32 %v3998_v38, %v1444_v2  ;;  %2495 = vmatprep.mubr.f32.mxu1 %v1474_v10  ;;  %v4002_v10 = vld [vmem:[#allocation7_spill] sm:$0xff]  ;;  %s2756_s16 = scalar_lea.vmem %s1889_s4, 2048  ;;  %p2761_p1 = scmp.lt.s32.totalorder %s1889_s4, %s1889_s4 }
 0x517   :  { %2496 = vmatmul.mubr.f32.gmra.mrb[60].mxu1 %v1475_v39  ;;  %v1477_v28 = vsub.f32 %v1427_v57, %v1461_v26  ;;  %2726 = vmatprep.subr.bf16.mxu0 %v2725_v52  ;;  %p2757_p0 = scmp.ne.s32.totalorder %s1889_s4, %s2756_s16  ;;  %p2762_p2 = scmp.lt.s32.totalorder %s2756_s16, %s2756_s16 }
 0x518   :  { %v1476_v7 = vsub.f32 %v1422_v5, %v1460_v31  ;;  %2739 = vmatprep.subr.bf16.mxu1 %v2725_v52  ;;  %2728 = vmatpush3.bf16.msra.mxu0 %v2725_v52  ;;  %v4001_v5 = vld [vmem:[#allocation9_spill] sm:$0xff] }
 0x519   :  { %2747 = vmatpush3.bf16.msra.mxu1 %v2725_v52  ;;  %2730 = vmatprep.subr.bf16.mxu0 %v2729_v32  ;;  %p2763_p3 = por %p2762_p2, %p2761_p1 }
 0x51a   :  { %2498 = vmatprep.mubr.f32.mxu1 %v1476_v7  ;;  %2740 = vmatprep.subr.bf16.mxu1 %v2729_v32 }
 0x51b   :  { %2499 = vmatmul.mubr.f32.gmra.mrb[62].mxu1 %v1477_v28  ;;  %p2764_p4 = pnand %p2763_p3, %p2757_p0 }
 0x51c   :  { %2732 = vmatpush3.bf16.msra.mxu0 %v2729_v32 }
 0x51d   :  { %2748 = vmatpush3.bf16.msra.mxu1 %v2729_v32 }
 0x5d2   :  { %v2479_v27 = vpop.f32.mrb[48].mxu1 }
 0x5d3   :  { %v1550_v22 = vadd.f32 %v2479_v27, %v3999_v21  ;;  %v1544_v57 = vpop.f32.mrb[49].mxu1 }
 0x5d4   :  { %v1545_v63 = vadd.f32 %v1544_v57, %v4000_v60 }
 0x5d5   :  { %v1624_v41 = vmax.f32 %v4001_v5, %v1550_v22 }
 0x5d6   :  { %v1623_v2 = vmax.f32 %v4002_v10, %v1545_v63  ;;  %v2482_v39 = vpop.f32.mrb[50].mxu1 }
 0x5d7   :  { %v1640_v26 = vmin.f32 %v3349_v1, %v1624_v41  ;;  %v1560_v31 = vadd.f32 %v2482_v39, %v3992_v24  ;;  %v1554_v7 = vpop.f32.mrb[51].mxu1 }
 0x5d8   :  { %v1639_v28 = vmin.f32 %v3334_v56, %v1623_v2  ;;  %v1555_v53 = vadd.f32 %v1554_v7, %v3993_v47 }
 0x5d9   :  { %v1656_v12 = vsub.f32 %v1550_v22, %v1640_v26  ;;  %v1626_v52 = vmax.f32 %v3994_v30, %v1560_v31 }
 0x5da   :  { %v1655_v9 = vsub.f32 %v1545_v63, %v1639_v28  ;;  %v1625_v32 = vmax.f32 %v4003_v8, %v1555_v53  ;;  %v2485_v27 = vpop.f32.mrb[52].mxu1 }
 0x5db   :  { %1849 = vst [vmem:[#allocation4 + $0x8] sm:$0xff] %v1656_v12  ;;  %v1642_v21 = vmin.f32 %v3367_v13, %v1626_v52  ;;  %v1570_v57 = vadd.f32 %v2485_v27, %v3609_v16  ;;  %v1564_v1 = vpop.f32.mrb[53].mxu1 }
 0x5dc   :  { %1848 = vst [vmem:[#allocation4] sm:$0xff] %v1655_v9  ;;  %v1641_v24 = vmin.f32 %v3342_v0, %v1625_v32  ;;  %v1565_v56 = vadd.f32 %v1564_v1, %v3614_v20  ;;  %2533 = vmatprep.mubr.f32.mxu0 %v1655_v9 }
 0x5dd   :  { %v1658_v47 = vsub.f32 %v1560_v31, %v1642_v21  ;;  %v1628_v22 = vmax.f32 %v3416_v54, %v1570_v57  ;;  %2534 = vmatmul.mubr.f32.vlgmr.msra.gmra.mrb[48].mxu0 %v1656_v12 }
 0x5de   :  { %v1657_v30 = vsub.f32 %v1555_v53, %v1641_v24  ;;  %v1627_v60 = vmax.f32 %v3389_v29, %v1565_v56  ;;  %v2488_v63 = vpop.f32.mrb[54].mxu1 }
 0x5df   :  { %1851 = vst [vmem:[#allocation4 + $0x18] sm:$0xff] %v1658_v47  ;;  %v1644_v13 = vmin.f32 %v3396_v37, %v1628_v22  ;;  %v1580_v16 = vadd.f32 %v2488_v63, %v3623_v35  ;;  %v1574_v5 = vpop.f32.mrb[55].mxu1 }
 0x5e0   :  { %1850 = vst [vmem:[#allocation4 + $0x10] sm:$0xff] %v1657_v30  ;;  %v1643_v0 = vmin.f32 %v3374_v14, %v1627_v60  ;;  %v1575_v20 = vadd.f32 %v1574_v5, %v3628_v55  ;;  %2536 = vmatprep.mubr.f32.mxu0 %v1657_v30 }
 0x5e1   :  { %v1660_v41 = vsub.f32 %v1570_v57, %v1644_v13  ;;  %v1630_v54 = vmax.f32 %v3447_v33, %v1580_v16  ;;  %2537 = vmatmul.mubr.f32.gmra.mrb[50].mxu0 %v1658_v47 }
 0x5e2   :  { %v1659_v10 = vsub.f32 %v1565_v56, %v1643_v0  ;;  %v1629_v29 = vmax.f32 %v3419_v58, %v1575_v20  ;;  %v2491_v2 = vpop.f32.mrb[56].mxu1 }
 0x5e3   :  { %1853 = vst [vmem:[#allocation4 + $0x28] sm:$0xff] %v1660_v41  ;;  %v1646_v37 = vmin.f32 %v3426_v4, %v1630_v54  ;;  %v1590_v35 = vadd.f32 %v2491_v2, %v3637_v50  ;;  %v1584_v39 = vpop.f32.mrb[57].mxu1 }
 0x5e4   :  { %1852 = vst [vmem:[#allocation4 + $0x20] sm:$0xff] %v1659_v10  ;;  %v1645_v14 = vmin.f32 %v3403_v45, %v1629_v29  ;;  %v1585_v55 = vadd.f32 %v1584_v39, %v3642_v44  ;;  %2539 = vmatprep.mubr.f32.mxu0 %v1659_v10 }
 0x5e5   :  { %v1662_v26 = vsub.f32 %v1580_v16, %v1646_v37  ;;  %v1632_v33 = vmax.f32 %v3479_v61, %v1590_v35  ;;  %2540 = vmatmul.mubr.f32.gmra.mrb[52].mxu0 %v1660_v41 }
 0x5e6   :  { %v1661_v31 = vsub.f32 %v1575_v20, %v1645_v14  ;;  %v1631_v58 = vmax.f32 %v3450_v34, %v1585_v55  ;;  %v2494_v7 = vpop.f32.mrb[58].mxu1 }
 0x5e7   :  { %1855 = vst [vmem:[#allocation4 + $0x38] sm:$0xff] %v1662_v26  ;;  %v1648_v4 = vmin.f32 %v3458_v48, %v1632_v33  ;;  %v1600_v50 = vadd.f32 %v2494_v7, %v3651_v40  ;;  %v1594_v28 = vpop.f32.mrb[59].mxu1 }
 0x5e8   :  { %1854 = vst [vmem:[#allocation4 + $0x30] sm:$0xff] %v1661_v31  ;;  %v1647_v45 = vmin.f32 %v3433_v6, %v1631_v58  ;;  %v1595_v44 = vadd.f32 %v1594_v28, %v3656_v11  ;;  %2542 = vmatprep.mubr.f32.mxu0 %v1661_v31 }
 0x5e9   :  { %v1664_v53 = vsub.f32 %v1590_v35, %v1648_v4  ;;  %v1634_v61 = vmax.f32 %v3511_v49, %v1600_v50  ;;  %2543 = vmatmul.mubr.f32.gmra.mrb[54].mxu0 %v1662_v26 }
 0x5ea   :  { %v1663_v12 = vsub.f32 %v1585_v55, %v1647_v45  ;;  %v1633_v34 = vmax.f32 %v3482_v62, %v1595_v44  ;;  %v2497_v52 = vpop.f32.mrb[60].mxu1 }
 0x5eb   :  { %1857 = vst [vmem:[#allocation4 + $0x48] sm:$0xff] %v1664_v53  ;;  %v1650_v48 = vmin.f32 %v3490_v15, %v1634_v61  ;;  %v1610_v40 = vadd.f32 %v2497_v52, %v3665_v23  ;;  %v1604_v9 = vpop.f32.mrb[61].mxu1 }
 0x5ec   :  { %1856 = vst [vmem:[#allocation4 + $0x40] sm:$0xff] %v1663_v12  ;;  %v1649_v6 = vmin.f32 %v3465_v42, %v1633_v34  ;;  %v1605_v11 = vadd.f32 %v1604_v9, %v3670_v51  ;;  %2545 = vmatprep.mubr.f32.mxu0 %v1663_v12 }
 0x5ed   :  { %v1666_v8 = vsub.f32 %v1600_v50, %v1650_v48  ;;  %v1636_v49 = vmax.f32 %v3543_v36, %v1610_v40  ;;  %2546 = vmatmul.mubr.f32.gmra.mrb[56].mxu0 %v1664_v53 }
 0x5ee   :  { %v1665_v32 = vsub.f32 %v1595_v44, %v1649_v6  ;;  %v1635_v62 = vmax.f32 %v3514_v17, %v1605_v11  ;;  %v2500_v27 = vpop.f32.mrb[62].mxu1 }
 0x5ef   :  { %1859 = vst [vmem:[#allocation4 + $0x58] sm:$0xff] %v1666_v8  ;;  %v1652_v15 = vmin.f32 %v3522_v3, %v1636_v49  ;;  %v1620_v23 = vadd.f32 %v2500_v27, %v3679_v25  ;;  %v1614_v21 = vpop.f32.mrb[63].mxu1 }
 0x5f0   :  { %1858 = vst [vmem:[#allocation4 + $0x50] sm:$0xff] %v1665_v32  ;;  %v1651_v42 = vmin.f32 %v3497_v43, %v1635_v62  ;;  %v1615_v51 = vadd.f32 %v1614_v21, %v3684_v59  ;;  %2548 = vmatprep.mubr.f32.mxu0 %v1665_v32 }
 0x5f1   :  { %v1668_v57 = vsub.f32 %v1610_v40, %v1652_v15  ;;  %v1638_v36 = vmax.f32 %v3995_v18, %v1620_v23  ;;  %2549 = vmatmul.mubr.f32.gmra.mrb[58].mxu0 %v1666_v8 }
 0x5f2   :  { %v1667_v1 = vsub.f32 %v1605_v11, %v1651_v42  ;;  %v1637_v17 = vmax.f32 %v3996_v46, %v1615_v51 }
 0x5f3   :  { %1861 = vst [vmem:[#allocation4 + $0x68] sm:$0xff] %v1668_v57  ;;  %v1654_v24 = vmin.f32 %v3997_v19, %v1638_v36 }
 0x5f4   :  { %1860 = vst [vmem:[#allocation4 + $0x60] sm:$0xff] %v1667_v1  ;;  %v1653_v3 = vmin.f32 %v3998_v38, %v1637_v17  ;;  %2551 = vmatprep.mubr.f32.mxu0 %v1667_v1 }
 0x5f5   :  { %v1670_v25 = vsub.f32 %v1620_v23, %v1654_v24  ;;  %2552 = vmatmul.mubr.f32.gmra.mrb[60].mxu0 %v1668_v57 }
 0x5f6   :  { %v1669_v43 = vsub.f32 %v1615_v51, %v1653_v3 }
 0x5f7   :  { %1863 = vst [vmem:[#allocation4 + $0x78] sm:$0xff] %v1670_v25 }
 0x5f8   :  { %1862 = vst [vmem:[#allocation4 + $0x70] sm:$0xff] %v1669_v43  ;;  %2554 = vmatprep.mubr.f32.mxu1 %v1669_v43 }
 0x5f9   :  { %2555 = vmatmul.mubr.f32.vlgmr.msra.gmra.mrb[64].mxu1 %v1670_v25 }
 0x5fa   :  { %2767 = shalt.err (!%p2764_p4)
}
 0x5fb   :  { %s2768_s7 = scalar_lea.hbm %s3959_s14, 2048 }
 0x5fc   :  { %p2769_p5 = scmp.ne.s32.totalorder %s3959_s14, %s2768_s7  ;;  %p2772_p6 = scmp.lt.u32.totalorder %s2768_s7, %s3959_s14 }
 0x5fe   :  { %p2774_p7 = pnand %p2772_p6, %p2769_p5 }
 0x600   :  { %2777 = shalt.err (!%p2774_p7)
}
 0x601   :  { %s2781_s20 = smov 128   ;;  %s2782_s21 = smov 8  }
 0x602   :  { %1894 = dma.vmem_to_hbm [thread:$0]  %s1889_s4, 2048, %s3959_s14, [#allocation5], %s2781_s20, %s2781_s20, %s2782_s21  }
 0x6b0   :  { %v2535_v59 = vpop.f32.mrb[48].mxu0 }
 0x6b1   :  { %1833 = vst.msk [vmem:[%s3958_s13 + $0x8] sm:$0xff] %vm81_vm0, %v2535_v59  ;;  %v1753_v18 = vpop.f32.mrb[49].mxu0 }
 0x6b2   :  { %1832 = vst.msk [vmem:[%s3958_s13] sm:$0xff] %vm81_vm0, %v1753_v18 }
 0x6b4   :  { %v2538_v46 = vpop.f32.mrb[50].mxu0 }
 0x6b5   :  { %1835 = vst.msk [vmem:[%s3958_s13 + $0x18] sm:$0xff] %vm81_vm0, %v2538_v46  ;;  %v1763_v19 = vpop.f32.mrb[51].mxu0 }
 0x6b6   :  { %1834 = vst.msk [vmem:[%s3958_s13 + $0x10] sm:$0xff] %vm81_vm0, %v1763_v19 }
 0x6b8   :  { %v2541_v38 = vpop.f32.mrb[52].mxu0 }
 0x6b9   :  { %1837 = vst.msk [vmem:[%s3958_s13 + $0x28] sm:$0xff] %vm81_vm0, %v2541_v38  ;;  %v1773_v56 = vpop.f32.mrb[53].mxu0 }
 0x6ba   :  { %1836 = vst.msk [vmem:[%s3958_s13 + $0x20] sm:$0xff] %vm81_vm0, %v1773_v56 }
 0x6bc   :  { %v2544_v47 = vpop.f32.mrb[54].mxu0 }
 0x6bd   :  { %1839 = vst.msk [vmem:[%s3958_s13 + $0x38] sm:$0xff] %vm81_vm0, %v2544_v47  ;;  %v1783_v22 = vpop.f32.mrb[55].mxu0 }
 0x6be   :  { %1838 = vst.msk [vmem:[%s3958_s13 + $0x30] sm:$0xff] %vm81_vm0, %v1783_v22 }
 0x6c0   :  { %v2547_v30 = vpop.f32.mrb[56].mxu0 }
 0x6c1   :  { %1841 = vst.msk [vmem:[%s3958_s13 + $0x48] sm:$0xff] %vm81_vm0, %v2547_v30  ;;  %v1793_v60 = vpop.f32.mrb[57].mxu0 }
 0x6c2   :  { %1840 = vst.msk [vmem:[%s3958_s13 + $0x40] sm:$0xff] %vm81_vm0, %v1793_v60 }
 0x6c4   :  { %v2550_v63 = vpop.f32.mrb[58].mxu0 }
 0x6c5   :  { %1843 = vst.msk [vmem:[%s3958_s13 + $0x58] sm:$0xff] %vm81_vm0, %v2550_v63  ;;  %v1803_v13 = vpop.f32.mrb[59].mxu0 }
 0x6c6   :  { %1842 = vst.msk [vmem:[%s3958_s13 + $0x50] sm:$0xff] %vm81_vm0, %v1803_v13 }
 0x6c8   :  { %v2553_v16 = vpop.f32.mrb[60].mxu0 }
 0x6c9   :  { %1845 = vst.msk [vmem:[%s3958_s13 + $0x68] sm:$0xff] %vm81_vm0, %v2553_v16  ;;  %v1813_v5 = vpop.f32.mrb[61].mxu0 }
 0x6ca   :  { %1844 = vst.msk [vmem:[%s3958_s13 + $0x60] sm:$0xff] %vm81_vm0, %v1813_v5 }
 0x6cc   :  { %v2556_v0 = vpop.f32.mrb[64].mxu1 }
 0x6cd   :  { %1847 = vst.msk [vmem:[%s3958_s13 + $0x78] sm:$0xff] %vm81_vm0, %v2556_v0  ;;  %v1823_v20 = vpop.f32.mrb[65].mxu1 }
 0x6ce   :  { %1846 = vst.msk [vmem:[%s3958_s13 + $0x70] sm:$0xff] %vm81_vm0, %v1823_v20 }
 0x6cf   :  { %2778 = dma.done.wait [#allocation5], 2048  }
 0x6d0   :  { %2779 = vsyncadd [#allocation5], 4294965248 }
 0x6d1   :  { %1904 = vsyncpa [#allocation5], 1 }

</bundles_post_ra>
